<compile_context>
chip_gen: v7x
topology: tpu7x:2x2x1
jax: 0.10.0
libtpu: 0.0.40
codegen_flags: <defaults>
</compile_context>

<pallas_src>
import jax
import jax.numpy as jnp
import numpy as np
from jax.experimental import pallas as pl
from jax.experimental.pallas import tpu as pltpu


# Geometry (28x28 input, 3x3 SAME convs, 2x2 maxpools, fc 32*7*7 -> 10):
#   conv1 works on the 30x30 padded image flattened to 900; the conv1 matmul
#   uses flat columns l = 30*h + w and needs width 838 (so the pooling slices
#   l, l+1, l+30, l+31 stay in range for the selected l = 60*i + 2*j).
#   The pooled 14x14 map is re-padded into a flattened 16x16 (=256) map; the
#   conv2 matmul uses flat columns l = 16*h + w with width 222, and its pool
#   keeps l = 32*i + 2*j.
CONV1_W = 838
POOL1_W = 807     # CONV1_W - 31
CONV2_W = 222
POOL2_W = 205     # CONV2_W - 17
OUT_PAD = 128     # fc output padded 10 -> 128 for an unmasked lane-dense store


def cnn_fused_kernel(x_ref, w1_ref, b1_ref, sp1_ref, w2_ref, b2_ref,
                     wfc_ref, dsel_ref, rsel_ref, bf_ref, out_ref,
                     p1_ref, p2_ref):
    """Entire CNN forward for one image; all intermediates live in VMEM.

    x_ref    (1, 1, 900)  zero-padded 30x30 image, row-major flattened
    w1_ref   (16, 9)      conv1 weights, columns ordered (kh, kw)
    b1_ref   (16, 1)
    sp1_ref  (807, 256)   0/1: stride-2 pool selection + zero-pad placement
                          into the flattened 16x16 conv2 input map
    w2_ref   (32, 144)    conv2 weights, columns ordered (kh, kw, cin)
    b2_ref   (32, 1)
    wfc_ref  (205, 320)   fc weights with pooled-pixel selection and the
                          PyTorch (C,H,W) flatten folded in; column block
                          [c*10, c*10+10) belongs to conv2 channel c
    dsel_ref (32, 320)    0/1 mask selecting column block c of row c
    rsel_ref (320, 128)   0/1 matrix folding the 32 column blocks into 10
                          (zero-padded to 128) logit columns
    bf_ref   (1, 128)     fc bias, zero padded
    out_ref  (1, 1, 128)  logits (first 10 columns valid)
    p1_ref   (9, 838)     VMEM staging for the conv1 im2col matrix
    p2_ref   (144, 222)   VMEM staging for the conv2 im2col matrix
    """
    x = x_ref[0]                                                   # (1, 900)

    # ---- conv1: in-kernel im2col (9 shifted slices) + ONE matmul ----------
    for k in range(9):
        kh, kw = k // 3, k % 3
        off = 30 * kh + kw
        p1_ref[pl.ds(k, 1), :] = x[:, off:off + CONV1_W]
    y1 = jnp.dot(w1_ref[...], p1_ref[...],
                 preferred_element_type=jnp.float32) + b1_ref[...]
    y1 = jnp.maximum(y1, 0.0)                                      # (16, 838)

    # ---- relu'd conv1 -> 2x2 maxpool: max of 4 shifted slices --------------
    m1 = jnp.maximum(jnp.maximum(y1[:, 0:807], y1[:, 1:808]),
                     jnp.maximum(y1[:, 30:837], y1[:, 31:838]))    # (16, 807)
    # stride-2 selection + zero re-padding folded into one small 0/1 matmul
    pooled1 = jnp.dot(m1, sp1_ref[...],
                      preferred_element_type=jnp.float32)          # (16, 256)

    # ---- conv2: in-kernel im2col + ONE matmul ------------------------------
    for k in range(9):
        kh, kw = k // 3, k % 3
        off = 16 * kh + kw
        p2_ref[pl.ds(16 * k, 16), :] = pooled1[:, off:off + CONV2_W]
    y2 = jnp.dot(w2_ref[...], p2_ref[...],
                 preferred_element_type=jnp.float32) + b2_ref[...]
    y2 = jnp.maximum(y2, 0.0)                                      # (32, 222)

    m2 = jnp.maximum(jnp.maximum(y2[:, 0:205], y2[:, 1:206]),
                     jnp.maximum(y2[:, 16:221], y2[:, 17:222]))    # (32, 205)

    # ---- fc, fused: pool selection + (C,H,W) flatten folded into wfc -------
    t = jnp.dot(m2, wfc_ref[...],
                preferred_element_type=jnp.float32)                # (32, 320)
    # Sum over channel rows BEFORE the block-fold projection: the final
    # matmul becomes (1,320)x(320,128) instead of (32,320)x(320,128).
    s = jnp.sum(t * dsel_ref[...], axis=0, keepdims=True)          # (1, 320)
    logits = jnp.dot(s, rsel_ref[...],
                     preferred_element_type=jnp.float32) + bf_ref[...]  # (1,128)
    out_ref[0] = logits.astype(out_ref.dtype)


# ------------------------------ wrapper --------------------------------------

def cnn_forward(x_nchw, prepped):
    """Matches CNN.forward.  x_nchw: (N, 1, 28, 28) f32 -> (N, 10) f32."""
    (w1t, b1c, sp1, w2t, b2c, wfc, dsel, rsel, bfp) = prepped
    N = x_nchw.shape[0]
    xp = jnp.pad(x_nchw[:, 0], ((0, 0), (1, 1), (1, 1)))           # (N, 30, 30)
    xflat = xp.reshape(N, 1, 900)
    out = pl.pallas_call(
        cnn_fused_kernel,
        out_shape=jax.ShapeDtypeStruct((N, 1, OUT_PAD), jnp.float32),
        grid=(N,),
        in_specs=[
            pl.BlockSpec((1, 1, 900), lambda n: (n, 0, 0)),
            pl.BlockSpec((16, 9), lambda n: (0, 0)),
            pl.BlockSpec((16, 1), lambda n: (0, 0)),
            pl.BlockSpec((POOL1_W, 256), lambda n: (0, 0)),
            pl.BlockSpec((32, 144), lambda n: (0, 0)),
            pl.BlockSpec((32, 1), lambda n: (0, 0)),
            pl.BlockSpec((POOL2_W, 320), lambda n: (0, 0)),
            pl.BlockSpec((32, 320), lambda n: (0, 0)),
            pl.BlockSpec((320, OUT_PAD), lambda n: (0, 0)),
            pl.BlockSpec((1, OUT_PAD), lambda n: (0, 0)),
        ],
        out_specs=pl.BlockSpec((1, 1, OUT_PAD), lambda n: (n, 0, 0)),
        scratch_shapes=[pltpu.VMEM((9, CONV1_W), jnp.float32),
                        pltpu.VMEM((144, CONV2_W), jnp.float32)],
        compiler_params=pltpu.CompilerParams(
            dimension_semantics=("parallel",)),
    )(xflat, w1t, b1c, sp1, w2t, b2c, wfc, dsel, rsel, bfp)
    return out.reshape(N, OUT_PAD)[:, :10]


def prepare_params(params):
    """One-time (numpy) re-layout of the PyTorch-convention parameters."""
    w1, b1, w2, b2, wf, bf = [np.asarray(p, np.float32) for p in params]
    w1t = np.ascontiguousarray(w1.reshape(9, 16).T)                 # (16, 9)
    b1c = b1.reshape(16, 1)
    w2t = np.ascontiguousarray(w2.reshape(144, 32).T)               # (32, 144)
    b2c = b2.reshape(32, 1)

    # Pool selection + zero re-pad: row 60*i + 2*j -> col 16*(i+1) + (j+1).
    sp1 = np.zeros((POOL1_W, 256), np.float32)
    for i in range(14):
        for j in range(14):
            sp1[60 * i + 2 * j, 16 * (i + 1) + (j + 1)] = 1.0

    # FC weights with the pooled-pixel selection + (C=32, 7, 7) flatten folded
    # in: row 32*(p//7) + 2*(p%7) of column block c holds wf[c*49 + p, :].
    wfr = wf.reshape(32, 49, 10)
    wfc = np.zeros((POOL2_W, 320), np.float32)
    for p in range(49):
        wfc[32 * (p // 7) + 2 * (p % 7), :] = wfr[:, p, :].reshape(320)

    dsel = np.zeros((32, 320), np.float32)
    for c in range(32):
        dsel[c, c * 10:(c + 1) * 10] = 1.0
    rsel = np.zeros((320, OUT_PAD), np.float32)
    for q in range(320):
        rsel[q, q % 10] = 1.0
    bfp = np.zeros((1, OUT_PAD), np.float32)
    bfp[0, :10] = bf
    return tuple(jnp.asarray(a) for a in
                 (w1t, b1c, sp1, w2t, b2c, wfc, dsel, rsel, bfp))


# ----------------------- pure-JAX reference (for check) ----------------------

def reference_forward(x_nchw, params):
    w1, b1, w2, b2, wf, bf = params
    hi = jax.lax.Precision.HIGHEST
    x = jnp.transpose(x_nchw, (0, 2, 3, 1))
    dn = ('NHWC', 'HWIO', 'NHWC')
    y = jax.lax.conv_general_dilated(x, w1, (1, 1), 'SAME',
                                     dimension_numbers=dn, precision=hi) + b1
    y = jnp.maximum(y, 0.0)
    y = jax.lax.reduce_window(y, -jnp.inf, jax.lax.max,
                              (1, 2, 2, 1), (1, 2, 2, 1), 'VALID')
    y = jax.lax.conv_general_dilated(y, w2, (1, 1), 'SAME',
                                     dimension_numbers=dn, precision=hi) + b2
    y = jnp.maximum(y, 0.0)
    y = jax.lax.reduce_window(y, -jnp.inf, jax.lax.max,
                              (1, 2, 2, 1), (1, 2, 2, 1), 'VALID')
    y = jnp.transpose(y, (0, 3, 1, 2)).reshape(x.shape[0], -1)
    return jnp.dot(y, wf, precision=hi) + bf


# --------------------------------- main ---------------------------------------

def init_params(key):
    k1, k2, k3, k4 = jax.random.split(key, 4)
    w1 = 0.1 * jax.random.normal(k1, (3, 3, 1, 16), dtype=jnp.float32)   # HWIO
    b1 = jnp.linspace(-0.05, 0.05, 16, dtype=jnp.float32)
    w2 = 0.1 * jax.random.normal(k2, (3, 3, 16, 32), dtype=jnp.float32)  # HWIO
    b2 = jnp.linspace(-0.05, 0.05, 32, dtype=jnp.float32)
    wf = 0.05 * jax.random.normal(k3, (32 * 7 * 7, 10), dtype=jnp.float32)
    bf = 0.01 * jax.random.normal(k4, (10,), dtype=jnp.float32)
    return (w1, b1, w2, b2, wf, bf)


if __name__ == "__main__":
    key = jax.random.PRNGKey(0)
    kx, kp = jax.random.split(key)
    # MNIST-like input: 28x28 is required by the fc layer (32*7*7). batch=2.
    x = jax.random.normal(kx, (2, 1, 28, 28), dtype=jnp.float32)
    params = init_params(kp)
    prepped = prepare_params(params)

    out = jax.jit(cnn_forward)(x, prepped)
    out = jax.block_until_ready(out)
    assert out.shape == (2, 10) and out.dtype == jnp.float32

    ref = jax.block_until_ready(reference_forward(x, params))
    np.testing.assert_allclose(np.asarray(out), np.asarray(ref),
                               rtol=5e-2, atol=5e-2)
    print("KERNEL_OK")
</pallas_src>

<mosaic_0001>
module attributes {stable_mosaic.version = 11 : i64} {
  func.func @cnn_fused_kernel(%arg0: i32, %arg1: memref<1x1x900xf32, #tpu.memory_space<vmem>>, %arg2: memref<16x9xf32, #tpu.memory_space<vmem>>, %arg3: memref<16x1xf32, #tpu.memory_space<vmem>>, %arg4: memref<807x256xf32, #tpu.memory_space<vmem>>, %arg5: memref<32x144xf32, #tpu.memory_space<vmem>>, %arg6: memref<32x1xf32, #tpu.memory_space<vmem>>, %arg7: memref<205x320xf32, #tpu.memory_space<vmem>>, %arg8: memref<32x320xf32, #tpu.memory_space<vmem>>, %arg9: memref<320x128xf32, #tpu.memory_space<vmem>>, %arg10: memref<1x128xf32, #tpu.memory_space<vmem>>, %arg11: memref<1x1x128xf32, #tpu.memory_space<vmem>>, %arg12: memref<9x838xf32, #tpu.memory_space<vmem>>, %arg13: memref<144x222xf32, #tpu.memory_space<vmem>>) attributes {dimension_semantics = [#tpu.dimension_semantics<parallel>], iteration_bounds = array<i64: 2>, scalar_prefetch = 0 : i64, scratch_operands = 2 : i64, tpu.core_type = #tpu.core_type<tc>, window_params = [{transform_indices = @transform_0, window_bounds = array<i64: 1, 1, 900>}, {pipeline_mode = #tpu.pipeline_mode<synchronous>, transform_indices = @transform_1, window_bounds = array<i64: 16, 9>}, {pipeline_mode = #tpu.pipeline_mode<synchronous>, transform_indices = @transform_2, window_bounds = array<i64: 16, 1>}, {pipeline_mode = #tpu.pipeline_mode<synchronous>, transform_indices = @transform_3, window_bounds = array<i64: 807, 256>}, {pipeline_mode = #tpu.pipeline_mode<synchronous>, transform_indices = @transform_4, window_bounds = array<i64: 32, 144>}, {pipeline_mode = #tpu.pipeline_mode<synchronous>, transform_indices = @transform_5, window_bounds = array<i64: 32, 1>}, {pipeline_mode = #tpu.pipeline_mode<synchronous>, transform_indices = @transform_6, window_bounds = array<i64: 205, 320>}, {pipeline_mode = #tpu.pipeline_mode<synchronous>, transform_indices = @transform_7, window_bounds = array<i64: 32, 320>}, {pipeline_mode = #tpu.pipeline_mode<synchronous>, transform_indices = @transform_8, window_bounds = array<i64: 320, 128>}, {pipeline_mode = #tpu.pipeline_mode<synchronous>, transform_indices = @transform_9, window_bounds = array<i64: 1, 128>}, {transform_indices = @transform_10, window_bounds = array<i64: 1, 1, 128>}]} {
    %c0 = arith.constant 0 : index
    %c0_0 = arith.constant 0 : index
    %c0_1 = arith.constant 0 : index
    %0 = vector.load %arg1[%c0, %c0_0, %c0_1] : memref<1x1x900xf32, #tpu.memory_space<vmem>>, vector<1x1x900xf32>
    %1 = vector.shape_cast %0 : vector<1x1x900xf32> to vector<1x900xf32>
    %2 = vector.extract_strided_slice %1 {offsets = [0, 0], sizes = [1, 838], strides = [1, 1]} : vector<1x900xf32> to vector<1x838xf32>
    %c0_2 = arith.constant 0 : index
    %c0_3 = arith.constant 0 : index
    %3 = vector.load %arg12[%c0_2, %c0_3] : memref<9x838xf32, #tpu.memory_space<vmem>>, vector<1x838xf32>
    tpu.vector_store %arg12[%c0_2, %c0_3], %2 {strides = array<i32>} : memref<9x838xf32, #tpu.memory_space<vmem>>, vector<1x838xf32>,
    %4 = vector.extract_strided_slice %1 {offsets = [0, 1], sizes = [1, 838], strides = [1, 1]} : vector<1x900xf32> to vector<1x838xf32>
    %c1 = arith.constant 1 : index
    %c0_4 = arith.constant 0 : index
    %5 = vector.load %arg12[%c1, %c0_4] : memref<9x838xf32, #tpu.memory_space<vmem>>, vector<1x838xf32>
    tpu.vector_store %arg12[%c1, %c0_4], %4 {strides = array<i32>} : memref<9x838xf32, #tpu.memory_space<vmem>>, vector<1x838xf32>,
    %6 = vector.extract_strided_slice %1 {offsets = [0, 2], sizes = [1, 838], strides = [1, 1]} : vector<1x900xf32> to vector<1x838xf32>
    %c2 = arith.constant 2 : index
    %c0_5 = arith.constant 0 : index
    %7 = vector.load %arg12[%c2, %c0_5] : memref<9x838xf32, #tpu.memory_space<vmem>>, vector<1x838xf32>
    tpu.vector_store %arg12[%c2, %c0_5], %6 {strides = array<i32>} : memref<9x838xf32, #tpu.memory_space<vmem>>, vector<1x838xf32>,
    %8 = vector.extract_strided_slice %1 {offsets = [0, 30], sizes = [1, 838], strides = [1, 1]} : vector<1x900xf32> to vector<1x838xf32>
    %c3 = arith.constant 3 : index
    %c0_6 = arith.constant 0 : index
    %9 = vector.load %arg12[%c3, %c0_6] : memref<9x838xf32, #tpu.memory_space<vmem>>, vector<1x838xf32>
    tpu.vector_store %arg12[%c3, %c0_6], %8 {strides = array<i32>} : memref<9x838xf32, #tpu.memory_space<vmem>>, vector<1x838xf32>,
    %10 = vector.extract_strided_slice %1 {offsets = [0, 31], sizes = [1, 838], strides = [1, 1]} : vector<1x900xf32> to vector<1x838xf32>
    %c4 = arith.constant 4 : index
    %c0_7 = arith.constant 0 : index
    %11 = vector.load %arg12[%c4, %c0_7] : memref<9x838xf32, #tpu.memory_space<vmem>>, vector<1x838xf32>
    tpu.vector_store %arg12[%c4, %c0_7], %10 {strides = array<i32>} : memref<9x838xf32, #tpu.memory_space<vmem>>, vector<1x838xf32>,
    %12 = vector.extract_strided_slice %1 {offsets = [0, 32], sizes = [1, 838], strides = [1, 1]} : vector<1x900xf32> to vector<1x838xf32>
    %c5 = arith.constant 5 : index
    %c0_8 = arith.constant 0 : index
    %13 = vector.load %arg12[%c5, %c0_8] : memref<9x838xf32, #tpu.memory_space<vmem>>, vector<1x838xf32>
    tpu.vector_store %arg12[%c5, %c0_8], %12 {strides = array<i32>} : memref<9x838xf32, #tpu.memory_space<vmem>>, vector<1x838xf32>,
    %14 = vector.extract_strided_slice %1 {offsets = [0, 60], sizes = [1, 838], strides = [1, 1]} : vector<1x900xf32> to vector<1x838xf32>
    %c6 = arith.constant 6 : index
    %c0_9 = arith.constant 0 : index
    %15 = vector.load %arg12[%c6, %c0_9] : memref<9x838xf32, #tpu.memory_space<vmem>>, vector<1x838xf32>
    tpu.vector_store %arg12[%c6, %c0_9], %14 {strides = array<i32>} : memref<9x838xf32, #tpu.memory_space<vmem>>, vector<1x838xf32>,
    %16 = vector.extract_strided_slice %1 {offsets = [0, 61], sizes = [1, 838], strides = [1, 1]} : vector<1x900xf32> to vector<1x838xf32>
    %c7 = arith.constant 7 : index
    %c0_10 = arith.constant 0 : index
    %17 = vector.load %arg12[%c7, %c0_10] : memref<9x838xf32, #tpu.memory_space<vmem>>, vector<1x838xf32>
    tpu.vector_store %arg12[%c7, %c0_10], %16 {strides = array<i32>} : memref<9x838xf32, #tpu.memory_space<vmem>>, vector<1x838xf32>,
    %18 = vector.extract_strided_slice %1 {offsets = [0, 62], sizes = [1, 838], strides = [1, 1]} : vector<1x900xf32> to vector<1x838xf32>
    %c8 = arith.constant 8 : index
    %c0_11 = arith.constant 0 : index
    %19 = vector.load %arg12[%c8, %c0_11] : memref<9x838xf32, #tpu.memory_space<vmem>>, vector<1x838xf32>
    tpu.vector_store %arg12[%c8, %c0_11], %18 {strides = array<i32>} : memref<9x838xf32, #tpu.memory_space<vmem>>, vector<1x838xf32>,
    %c0_12 = arith.constant 0 : index
    %c0_13 = arith.constant 0 : index
    %20 = vector.load %arg2[%c0_12, %c0_13] : memref<16x9xf32, #tpu.memory_space<vmem>>, vector<16x9xf32>
    %c0_14 = arith.constant 0 : index
    %c0_15 = arith.constant 0 : index
    %21 = vector.load %arg12[%c0_14, %c0_15] : memref<9x838xf32, #tpu.memory_space<vmem>>, vector<9x838xf32>
    %cst = arith.constant dense<0.000000e+00> : vector<16x838xf32>
    %22 = tpu.matmul %20, %21, %cst {dimension_numbers = #tpu.dot_dimension_numbers<[1], [0], [0], [1], [0, 0, 1, 1], [], []>} : vector<16x9xf32>, vector<9x838xf32>, vector<16x838xf32> -> vector<16x838xf32>
    %c0_16 = arith.constant 0 : index
    %c0_17 = arith.constant 0 : index
    %23 = vector.load %arg3[%c0_16, %c0_17] : memref<16x1xf32, #tpu.memory_space<vmem>>, vector<16x1xf32>
    %24 = vector.broadcast %23 : vector<16x1xf32> to vector<16x838xf32>
    %25 = arith.addf %22, %24 : vector<16x838xf32>
    %cst_18 = arith.constant 0.000000e+00 : f32
    %26 = vector.broadcast %cst_18 : f32 to vector<16x838xf32>
    %27 = arith.maximumf %25, %26 : vector<16x838xf32>
    %28 = vector.extract_strided_slice %27 {offsets = [0, 0], sizes = [16, 807], strides = [1, 1]} : vector<16x838xf32> to vector<16x807xf32>
    %29 = vector.extract_strided_slice %27 {offsets = [0, 1], sizes = [16, 807], strides = [1, 1]} : vector<16x838xf32> to vector<16x807xf32>
    %30 = arith.maximumf %28, %29 : vector<16x807xf32>
    %31 = vector.extract_strided_slice %27 {offsets = [0, 30], sizes = [16, 807], strides = [1, 1]} : vector<16x838xf32> to vector<16x807xf32>
    %32 = vector.extract_strided_slice %27 {offsets = [0, 31], sizes = [16, 807], strides = [1, 1]} : vector<16x838xf32> to vector<16x807xf32>
    %33 = arith.maximumf %31, %32 : vector<16x807xf32>
    %34 = arith.maximumf %30, %33 : vector<16x807xf32>
    %c0_19 = arith.constant 0 : index
    %c0_20 = arith.constant 0 : index
    %35 = vector.load %arg4[%c0_19, %c0_20] : memref<807x256xf32, #tpu.memory_space<vmem>>, vector<807x256xf32>
    %cst_21 = arith.constant dense<0.000000e+00> : vector<16x256xf32>
    %36 = tpu.matmul %34, %35, %cst_21 {dimension_numbers = #tpu.dot_dimension_numbers<[1], [0], [0], [1], [0, 0, 1, 1], [], []>} : vector<16x807xf32>, vector<807x256xf32>, vector<16x256xf32> -> vector<16x256xf32>
    %37 = vector.extract_strided_slice %36 {offsets = [0, 0], sizes = [16, 222], strides = [1, 1]} : vector<16x256xf32> to vector<16x222xf32>
    %c0_22 = arith.constant 0 : index
    %c0_23 = arith.constant 0 : index
    %38 = vector.load %arg13[%c0_22, %c0_23] : memref<144x222xf32, #tpu.memory_space<vmem>>, vector<16x222xf32>
    tpu.vector_store %arg13[%c0_22, %c0_23], %37 {strides = array<i32>} : memref<144x222xf32, #tpu.memory_space<vmem>>, vector<16x222xf32>,
    %39 = vector.extract_strided_slice %36 {offsets = [0, 1], sizes = [16, 222], strides = [1, 1]} : vector<16x256xf32> to vector<16x222xf32>
    %c16 = arith.constant 16 : index
    %c0_24 = arith.constant 0 : index
    %40 = vector.load %arg13[%c16, %c0_24] : memref<144x222xf32, #tpu.memory_space<vmem>>, vector<16x222xf32>
    tpu.vector_store %arg13[%c16, %c0_24], %39 {strides = array<i32>} : memref<144x222xf32, #tpu.memory_space<vmem>>, vector<16x222xf32>,
    %41 = vector.extract_strided_slice %36 {offsets = [0, 2], sizes = [16, 222], strides = [1, 1]} : vector<16x256xf32> to vector<16x222xf32>
    %c32 = arith.constant 32 : index
    %c0_25 = arith.constant 0 : index
    %42 = vector.load %arg13[%c32, %c0_25] : memref<144x222xf32, #tpu.memory_space<vmem>>, vector<16x222xf32>
    tpu.vector_store %arg13[%c32, %c0_25], %41 {strides = array<i32>} : memref<144x222xf32, #tpu.memory_space<vmem>>, vector<16x222xf32>,
    %43 = vector.extract_strided_slice %36 {offsets = [0, 16], sizes = [16, 222], strides = [1, 1]} : vector<16x256xf32> to vector<16x222xf32>
    %c48 = arith.constant 48 : index
    %c0_26 = arith.constant 0 : index
    %44 = vector.load %arg13[%c48, %c0_26] : memref<144x222xf32, #tpu.memory_space<vmem>>, vector<16x222xf32>
    tpu.vector_store %arg13[%c48, %c0_26], %43 {strides = array<i32>} : memref<144x222xf32, #tpu.memory_space<vmem>>, vector<16x222xf32>,
    %45 = vector.extract_strided_slice %36 {offsets = [0, 17], sizes = [16, 222], strides = [1, 1]} : vector<16x256xf32> to vector<16x222xf32>
    %c64 = arith.constant 64 : index
    %c0_27 = arith.constant 0 : index
    %46 = vector.load %arg13[%c64, %c0_27] : memref<144x222xf32, #tpu.memory_space<vmem>>, vector<16x222xf32>
    tpu.vector_store %arg13[%c64, %c0_27], %45 {strides = array<i32>} : memref<144x222xf32, #tpu.memory_space<vmem>>, vector<16x222xf32>,
    %47 = vector.extract_strided_slice %36 {offsets = [0, 18], sizes = [16, 222], strides = [1, 1]} : vector<16x256xf32> to vector<16x222xf32>
    %c80 = arith.constant 80 : index
    %c0_28 = arith.constant 0 : index
    %48 = vector.load %arg13[%c80, %c0_28] : memref<144x222xf32, #tpu.memory_space<vmem>>, vector<16x222xf32>
    tpu.vector_store %arg13[%c80, %c0_28], %47 {strides = array<i32>} : memref<144x222xf32, #tpu.memory_space<vmem>>, vector<16x222xf32>,
    %49 = vector.extract_strided_slice %36 {offsets = [0, 32], sizes = [16, 222], strides = [1, 1]} : vector<16x256xf32> to vector<16x222xf32>
    %c96 = arith.constant 96 : index
    %c0_29 = arith.constant 0 : index
    %50 = vector.load %arg13[%c96, %c0_29] : memref<144x222xf32, #tpu.memory_space<vmem>>, vector<16x222xf32>
    tpu.vector_store %arg13[%c96, %c0_29], %49 {strides = array<i32>} : memref<144x222xf32, #tpu.memory_space<vmem>>, vector<16x222xf32>,
    %51 = vector.extract_strided_slice %36 {offsets = [0, 33], sizes = [16, 222], strides = [1, 1]} : vector<16x256xf32> to vector<16x222xf32>
    %c112 = arith.constant 112 : index
    %c0_30 = arith.constant 0 : index
    %52 = vector.load %arg13[%c112, %c0_30] : memref<144x222xf32, #tpu.memory_space<vmem>>, vector<16x222xf32>
    tpu.vector_store %arg13[%c112, %c0_30], %51 {strides = array<i32>} : memref<144x222xf32, #tpu.memory_space<vmem>>, vector<16x222xf32>,
    %53 = vector.extract_strided_slice %36 {offsets = [0, 34], sizes = [16, 222], strides = [1, 1]} : vector<16x256xf32> to vector<16x222xf32>
    %c128 = arith.constant 128 : index
    %c0_31 = arith.constant 0 : index
    %54 = vector.load %arg13[%c128, %c0_31] : memref<144x222xf32, #tpu.memory_space<vmem>>, vector<16x222xf32>
    tpu.vector_store %arg13[%c128, %c0_31], %53 {strides = array<i32>} : memref<144x222xf32, #tpu.memory_space<vmem>>, vector<16x222xf32>,
    %c0_32 = arith.constant 0 : index
    %c0_33 = arith.constant 0 : index
    %55 = vector.load %arg5[%c0_32, %c0_33] : memref<32x144xf32, #tpu.memory_space<vmem>>, vector<32x144xf32>
    %c0_34 = arith.constant 0 : index
    %c0_35 = arith.constant 0 : index
    %56 = vector.load %arg13[%c0_34, %c0_35] : memref<144x222xf32, #tpu.memory_space<vmem>>, vector<144x222xf32>
    %cst_36 = arith.constant dense<0.000000e+00> : vector<32x222xf32>
    %57 = tpu.matmul %55, %56, %cst_36 {dimension_numbers = #tpu.dot_dimension_numbers<[1], [0], [0], [1], [0, 0, 1, 1], [], []>} : vector<32x144xf32>, vector<144x222xf32>, vector<32x222xf32> -> vector<32x222xf32>
    %c0_37 = arith.constant 0 : index
    %c0_38 = arith.constant 0 : index
    %58 = vector.load %arg6[%c0_37, %c0_38] : memref<32x1xf32, #tpu.memory_space<vmem>>, vector<32x1xf32>
    %59 = vector.broadcast %58 : vector<32x1xf32> to vector<32x222xf32>
    %60 = arith.addf %57, %59 : vector<32x222xf32>
    %cst_39 = arith.constant 0.000000e+00 : f32
    %61 = vector.broadcast %cst_39 : f32 to vector<32x222xf32>
    %62 = arith.maximumf %60, %61 : vector<32x222xf32>
    %63 = vector.extract_strided_slice %62 {offsets = [0, 0], sizes = [32, 205], strides = [1, 1]} : vector<32x222xf32> to vector<32x205xf32>
    %64 = vector.extract_strided_slice %62 {offsets = [0, 1], sizes = [32, 205], strides = [1, 1]} : vector<32x222xf32> to vector<32x205xf32>
    %65 = arith.maximumf %63, %64 : vector<32x205xf32>
    %66 = vector.extract_strided_slice %62 {offsets = [0, 16], sizes = [32, 205], strides = [1, 1]} : vector<32x222xf32> to vector<32x205xf32>
    %67 = vector.extract_strided_slice %62 {offsets = [0, 17], sizes = [32, 205], strides = [1, 1]} : vector<32x222xf32> to vector<32x205xf32>
    %68 = arith.maximumf %66, %67 : vector<32x205xf32>
    %69 = arith.maximumf %65, %68 : vector<32x205xf32>
    %c0_40 = arith.constant 0 : index
    %c0_41 = arith.constant 0 : index
    %70 = vector.load %arg7[%c0_40, %c0_41] : memref<205x320xf32, #tpu.memory_space<vmem>>, vector<205x320xf32>
    %cst_42 = arith.constant dense<0.000000e+00> : vector<32x320xf32>
    %71 = tpu.matmul %69, %70, %cst_42 {dimension_numbers = #tpu.dot_dimension_numbers<[1], [0], [0], [1], [0, 0, 1, 1], [], []>} : vector<32x205xf32>, vector<205x320xf32>, vector<32x320xf32> -> vector<32x320xf32>
    %c0_43 = arith.constant 0 : index
    %c0_44 = arith.constant 0 : index
    %72 = vector.load %arg8[%c0_43, %c0_44] : memref<32x320xf32, #tpu.memory_space<vmem>>, vector<32x320xf32>
    %73 = arith.mulf %71, %72 : vector<32x320xf32>
    %cst_45 = arith.constant dense<0.000000e+00> : vector<320xf32>
    %74 = vector.multi_reduction <add>, %73, %cst_45 [0] : vector<32x320xf32> to vector<320xf32>
    %75 = vector.shape_cast %74 : vector<320xf32> to vector<1x320xf32>
    %c0_46 = arith.constant 0 : index
    %c0_47 = arith.constant 0 : index
    %76 = vector.load %arg9[%c0_46, %c0_47] : memref<320x128xf32, #tpu.memory_space<vmem>>, vector<320x128xf32>
    %cst_48 = arith.constant dense<0.000000e+00> : vector<1x128xf32>
    %77 = tpu.matmul %75, %76, %cst_48 {dimension_numbers = #tpu.dot_dimension_numbers<[1], [0], [0], [1], [0, 0, 1, 1], [], []>} : vector<1x320xf32>, vector<320x128xf32>, vector<1x128xf32> -> vector<1x128xf32>
    %c0_49 = arith.constant 0 : index
    %c0_50 = arith.constant 0 : index
    %78 = vector.load %arg10[%c0_49, %c0_50] : memref<1x128xf32, #tpu.memory_space<vmem>>, vector<1x128xf32>
    %79 = arith.addf %77, %78 : vector<1x128xf32>
    %c0_51 = arith.constant 0 : index
    %c0_52 = arith.constant 0 : index
    %c0_53 = arith.constant 0 : index
    %80 = vector.load %arg11[%c0_51, %c0_52, %c0_53] : memref<1x1x128xf32, #tpu.memory_space<vmem>>, vector<1x1x128xf32>
    %81 = vector.shape_cast %80 : vector<1x1x128xf32> to vector<1x128xf32>
    %82 = vector.shape_cast %79 : vector<1x128xf32> to vector<1x1x128xf32>
    tpu.vector_store %arg11[%c0_51, %c0_52, %c0_53], %82 {strides = array<i32>} : memref<1x1x128xf32, #tpu.memory_space<vmem>>, vector<1x1x128xf32>,
    return
  }
  func.func @transform_0(%arg0: i32) -> (i32, i32, i32) {
    %c0_i32 = arith.constant 0 : i32
    %c0_i32_0 = arith.constant 0 : i32
    %c0_i32_1 = arith.constant 0 : i32
    return %arg0, %c0_i32, %c0_i32_0 : i32, i32, i32
  }
  func.func @transform_1(%arg0: i32) -> (i32, i32) {
    %c0_i32 = arith.constant 0 : i32
    %c0_i32_0 = arith.constant 0 : i32
    %c0_i32_1 = arith.constant 0 : i32
    return %c0_i32, %c0_i32_0 : i32, i32
  }
  func.func @transform_2(%arg0: i32) -> (i32, i32) {
    %c0_i32 = arith.constant 0 : i32
    %c0_i32_0 = arith.constant 0 : i32
    %c0_i32_1 = arith.constant 0 : i32
    return %c0_i32, %c0_i32_0 : i32, i32
  }
  func.func @transform_3(%arg0: i32) -> (i32, i32) {
    %c0_i32 = arith.constant 0 : i32
    %c0_i32_0 = arith.constant 0 : i32
    %c0_i32_1 = arith.constant 0 : i32
    return %c0_i32, %c0_i32_0 : i32, i32
  }
  func.func @transform_4(%arg0: i32) -> (i32, i32) {
    %c0_i32 = arith.constant 0 : i32
    %c0_i32_0 = arith.constant 0 : i32
    %c0_i32_1 = arith.constant 0 : i32
    return %c0_i32, %c0_i32_0 : i32, i32
  }
  func.func @transform_5(%arg0: i32) -> (i32, i32) {
    %c0_i32 = arith.constant 0 : i32
    %c0_i32_0 = arith.constant 0 : i32
    %c0_i32_1 = arith.constant 0 : i32
    return %c0_i32, %c0_i32_0 : i32, i32
  }
  func.func @transform_6(%arg0: i32) -> (i32, i32) {
    %c0_i32 = arith.constant 0 : i32
    %c0_i32_0 = arith.constant 0 : i32
    %c0_i32_1 = arith.constant 0 : i32
    return %c0_i32, %c0_i32_0 : i32, i32
  }
  func.func @transform_7(%arg0: i32) -> (i32, i32) {
    %c0_i32 = arith.constant 0 : i32
    %c0_i32_0 = arith.constant 0 : i32
    %c0_i32_1 = arith.constant 0 : i32
    return %c0_i32, %c0_i32_0 : i32, i32
  }
  func.func @transform_8(%arg0: i32) -> (i32, i32) {
    %c0_i32 = arith.constant 0 : i32
    %c0_i32_0 = arith.constant 0 : i32
    %c0_i32_1 = arith.constant 0 : i32
    return %c0_i32, %c0_i32_0 : i32, i32
  }
  func.func @transform_9(%arg0: i32) -> (i32, i32) {
    %c0_i32 = arith.constant 0 : i32
    %c0_i32_0 = arith.constant 0 : i32
    %c0_i32_1 = arith.constant 0 : i32
    return %c0_i32, %c0_i32_0 : i32, i32
  }
  func.func @transform_10(%arg0: i32) -> (i32, i32, i32) {
    %c0_i32 = arith.constant 0 : i32
    %c0_i32_0 = arith.constant 0 : i32
    %c0_i32_1 = arith.constant 0 : i32
    return %arg0, %c0_i32, %c0_i32_0 : i32, i32, i32
  }
}

</mosaic_0001>

<bundles_post_ra>
// kernel: cnn_forward.1
= control target key start
LH: loop header
LB: loop body
LE: loop exit
PB: predicated region body
PF: predicated region fallthrough
CT: control target
= control target key end

     0   :  { %15 = vsyncpa [#allocation5], 0  ;;  %s4397_s0 = inlined_call_operand.vmem [shape: f32[2,1,900], index: 0, kind: input, shape index: {}]   ;;  %s4398_s1 = inlined_call_operand.vmem [shape: f32[16,9], index: 1, kind: input, shape index: {}]   ;;  %s4399_s2 = inlined_call_operand.vmem [shape: f32[16,1], index: 2, kind: input, shape index: {}]   ;;  %s4400_s3 = inlined_call_operand.hbm [shape: f32[807,256], index: 3, kind: input, shape index: {}]   ;;  %s4401_s4 = inlined_call_operand.vmem [shape: f32[32,144], index: 4, kind: input, shape index: {}]   ;;  %s4402_s5 = inlined_call_operand.vmem [shape: f32[32,1], index: 5, kind: input, shape index: {}]   ;;  %s4403_s6 = inlined_call_operand.hbm [shape: f32[205,320], index: 6, kind: input, shape index: {}]   ;;  %s4404_s7 = inlined_call_operand.vmem [shape: f32[32,320], index: 7, kind: input, shape index: {}]   ;;  %s4405_s8 = inlined_call_operand.vmem [shape: f32[320,128], index: 8, kind: input, shape index: {}]   ;;  %s4406_s9 = inlined_call_operand.vmem [shape: f32[1,128], index: 9, kind: input, shape index: {}]   ;;  %s4407_s10 = inlined_call_operand.hbm [shape: f32[2,1,128], index: 10, kind: output, shape index: {}]  }
   0x1   :  { %16 = vsyncpa [#allocation8], 0 }
   0x2   :  { %17 = vsyncpa [#allocation6], 0 }
   0x3   :  { %19 = vsyncpa [#allocation6 + $0x1], 0  ;;  %s3431_s13 = smov 0   ;;  %s3433_s14 = smov 0  }
   0x4   :  { %s3435_s15 = smov 0   ;;  %s3437_s16 = smov 0  }
   0x5 LB: > { %4415 = sst [smem:[#allocation13_spill]] %s3345_s15  ;;  %s3452_s17 = sadd.s32 4294967295, %s3349_s16   ;;  %s3349_s16 = sphi %s3437_s16, %s4437_s16   ;;  %s3345_s15 = sphi %s3435_s15, %s4439_s15   ;;  %s3341_s14 = sphi %s3433_s14, %s4441_s14   ;;  %s3337_s13 = sphi %s3431_s13, %s4440_s13  }
   0x6   : > { %s2558_s18 = sadd.s32 4294967294, %s3349_s16   ;;  %s3456_s19 = sadd.s32 1, %s3349_s16  }
   0x7   : > { %4416 = sst [smem:[#allocation14_spill]] %s3456_s19  ;;  %s247_s20 = sadd.s32 1, %s3345_s15 }
   0x8   : > { %s244_s21 = ssub.s32 %s3349_s16, %s3456_s19  ;;  %p257_p0 = scmp.ne.s32.totalorder %s3345_s15, %s3341_s14 }
   0x9   : > { %p245_p1 = scmp.eq.s32.totalorder %s244_s21, 0  ;;  %p258_p2 = scmp.eq.s32.totalorder %s3452_s17, 1 }
   0xa   : > { %p263_p3 = scmp.ne.s32.totalorder %s3341_s14, %s3337_s13  ;;  %p264_p4 = scmp.eq.s32.totalorder %s2558_s18, 1 }
   0xb   : > { %s3467_s22 = scalar_select %p245_p1, %s3345_s15, %s247_s20  }
   0xc   : > { %p3469_p5 = por %p258_p2, %p257_p0  ;;  %p3473_p6 = por %p264_p4, %p263_p3 }
   0xd   : > { %4417 = sst [smem:[#allocation15_spill]] %s3467_s22  ;;  %p2559_p7 = scmp.ge.s32.totalorder %s3349_s16, 1 }
   0xe   : > { %s4418_s23 = scalar_select %p3469_p5, 1, 0 }
   0xf   : > { %s4419_s24 = scalar_select %p3473_p6, 1, 0 }
  0x10   : > { %p271_p8 = scmp.lt.s32.totalorder %s3349_s16, 3  ;;  %p4408_p9 = scmp.eq.s32.totalorder %s3452_s17, 0 }
  0x11   : > { %4420 = sst [smem:[#allocation16_spill]] %s4419_s24  ;;  %s3351_s26 = smov [#allocation4]  }
  0x12   : > { %p3480_p10 = pnand %p2559_p7, %p271_p8  ;;  %s289_s27 = sshll.u32 %s3351_s26, 4  ;;  %s290_s27 = int_to_ptr.vmem [resolvable:$true] %s289_s27 }
  0x13   : > { %s3352_s29 = smov [#allocation7]   ;;  %s3223_s18 = scalar_lea.hbm %s4400_s3, 25856 }
  0x14   : > { %s4421_s25 = scalar_select %p3480_p10, 1, 0 }
  0x15   : > { %p3099_p11 = pneg %p3480_p10  ;;  %s308_s30 = sshll.u32 %s3352_s29, 4  ;;  %s3492_s30 = int_to_ptr.vmem [resolvable:$true] %s308_s30 }
  0x16   : > { %p3224_p13 = scmp.ne.s32.totalorder %s4400_s3, %s3223_s18  ;;  %p3230_p3 = scmp.lt.u32.totalorder %s3223_s18, %s4400_s3 }
  0x17   : > { %p3488_p12 = pnand %p4408_p9, %p3099_p11 }
  0x19   : > { %p3225_p0 = pneg %p3488_p12 }
  0x1b   : > { %p3226_p1 = pnand %p3225_p0, %p3224_p13 }
  0x1d   : > { %p3227_p2 = pneg %p3226_p1 }
  0x1f   : > { %p3232_p4 = pnand %p3230_p3, %p3227_p2 }
  0x21   : > { %3235 = shalt.err (!%p3232_p4)
}
  0x22   : > { %s3236_s29 = scalar_lea.vmem %s290_s27, 25856  ;;  %p3244_p9 = scmp.lt.s32.totalorder %s290_s27, %s290_s27 }
  0x23   : > { %p3237_p7 = scmp.ne.s32.totalorder %s290_s27, %s3236_s29  ;;  %p3245_p6 = scmp.lt.s32.totalorder %s3236_s29, %s3236_s29 }
  0x25   : > { %p3239_p8 = pnand %p3237_p7, %p3225_p0  ;;  %p3246_p5 = por %p3245_p6, %p3244_p9 }
  0x27   : > { %p3240_p11 = pneg %p3239_p8 }
  0x29   : > { %p3247_p10 = pnand %p3246_p5, %p3240_p11 }
  0x2b   : > { %3250 = shalt.err (!%p3247_p10)
}
  0x2c   : > { %s3353_s11 = smov 256   ;;  %s3354_s12 = smov 16  }
  0x2d   : > { %3102 = dma.hbm_to_vmem [thread:$0]  (!%p3488_p12), %s4400_s3, 25856, %s290_s27, [#allocation5], %s3353_s11, %s3353_s11, %s3354_s12  }
  0x2e   : > { %s3251_s26 = scalar_lea.hbm %s4403_s6, 9984 }
  0x2f   : > { %p3252_p13 = scmp.ne.s32.totalorder %s4403_s6, %s3251_s26  ;;  %p3258_p9 = scmp.lt.u32.totalorder %s3251_s26, %s4403_s6 }
  0x31   : > { %p3254_p5 = pnand %p3252_p13, %p3225_p0 }
  0x33   : > { %p3255_p6 = pneg %p3254_p5 }
  0x35   : > { %p3260_p10 = pnand %p3258_p9, %p3255_p6 }
  0x37   : > { %3263 = shalt.err (!%p3260_p10)
}
  0x38   : > { %s3264_s27 = scalar_lea.vmem %s3492_s30, 9984  ;;  %p3272_p4 = scmp.lt.s32.totalorder %s3492_s30, %s3492_s30 }
  0x39   : > { %p3265_p1 = scmp.ne.s32.totalorder %s3492_s30, %s3264_s27  ;;  %p3273_p7 = scmp.lt.s32.totalorder %s3264_s27, %s3264_s27 }
  0x3b   : > { %p3267_p2 = pnand %p3265_p1, %p3225_p0  ;;  %p3274_p8 = por %p3273_p7, %p3272_p4 }
  0x3d   : > { %p3268_p3 = pneg %p3267_p2 }
  0x3f   : > { %p3275_p11 = pnand %p3274_p8, %p3268_p3 }
  0x41   : > { %3278 = shalt.err (!%p3275_p11)
}
  0x42   : > { %s3355_s15 = smov 384   ;;  %s3356_s19 = smov 24  }
  0x43   : > { %3105 = dma.hbm_to_vmem [thread:$0]  (!%p3488_p12), %s4403_s6, 9984, %s3492_s30, [#allocation8], %s3355_s15, %s3355_s15, %s3356_s19  }
  0x44   : > { %p4423_p13 = scmp.ne.s32.totalorder %s4421_s25, 0 }
  0x45   : > { %p4424_p0 = scmp.eq.s32.totalorder (!%p4423_p13), %s3452_s17, 0 }
  0x46   : > { %340 = sbr.rel (%p4423_p13) target bundleno = 2333 (0x91d), region = 60 }
  0x4d   : > { %3324 = dma.done.wait (%p4424_p0), [#allocation5], 25856   ;;  %p4425_p5 = pmov %p4424_p0 }
  0x4e   : > { %p4426_p6 = pmov %p4424_p0 }
  0x4f   : > { %3326 = vsyncadd (%p4425_p5), [#allocation5], 4294941440 }
  0x50   : > { %3328 = dma.done.wait (%p4426_p6), [#allocation8], 9984   ;;  %p4427_p9 = pmov %p4424_p0 }
  0x51   : > { %p380_p10 = scmp.lt.s32.totalorder %s3452_s17, 1  ;;  %v385_v0 = vlaneseq  ;;  %s3357_s18 = smov 98   ;;  %v3365_v3 = vmov 0.0   ;;  %v480_v4 = vld [vmem:[%s4399_s2] sm:$0xff]  ;;  %v481_v5 = vld [vmem:[%s4399_s2 + $0x8] sm:$0xff]  ;;  %v3366_v6 = vmov 0  }
  0x52   : > { %3330 = vsyncadd (%p4427_p9), [#allocation8], 4294957312  ;;  %s3358_s20 = smov 127   ;;  %s3359_s21 = smov 97   ;;  %585 = vmatprep.mubr.f32.mxu1 %v3365_v3  ;;  %739 = vmatprep.mubr.f32.mxu0 %v3365_v3  ;;  %vm413_vm1 = vcmask 801792   ;;  %vm395_vm2 = vcmask 1039360  }
  0x53   : > { %s381_s28 = scalar_select %p380_p10, %s3452_s17, 1  ;;  %vm3556_vm0 = vcmp.lt.s32.totalorder %v385_v0, 838  ;;  %3171 = vset.pattern.permute.xlu0 %v3366_v6  ;;  %3172 = vset.pattern.permute.xlu1 %v3366_v6  ;;  %vm422_vm3 = vcmask 793600   ;;  %vm404_vm4 = vcmask 1031168   ;;  %vm440_vm5 = vcmask 556032   ;;  %v464_v49 = vld [vmem:[%s4398_s1] sm:$0xff] }
  0x54   : > { %s3360_s26 = smov 126   ;;  %s3361_s29 = smov 68   ;;  %vm431_vm6 = vcmask 785408   ;;  %vm458_vm7 = vcmask 539648   ;;  %vm449_vm8 = vcmask 547840   ;;  %vm499_vm9 = vcmask 1040384  }
  0x55   : > { %s2566_s30 = sshll.u32 %s381_s28, 3  ;;  %s3362_s27 = smov 96   ;;  %vm3367_vm10 = vmmov 1   ;;  %vm492_vm12 = vcmask 72704   ;;  %v465_v54 = vld [vmem:[%s4398_s1 + $0x8] sm:$0xff]  ;;  %vm1214_vm13 = vcmask 1046528  }
  0x56   : > { %s383_s22 = scalar_lea.vmem %s4397_s0, %s2566_s30  ;;  %s3363_s15 = smov 66   ;;  %vm3613_vm11 = vmpackc.low %vm499_vm9, %vm3367_vm10  ;;  %vm1207_vm14 = vcmask 318464   ;;  %vm1530_vm15 = vcmask 769024   ;;  %vm2269_vm9 = vcmask 523264  }
  0x57   : > { %v384_v1 = vld [vmem:[%s383_s22] sm:$0xff]  ;;  %s3364_s19 = smov 67   ;;  %s3372_s24 = smov 94  }
  0x58   : > { %410 = vrot.lane.b32.xlu1 %v384_v1, %s3357_s18  ;;  %392 = vrot.lane.b32.xlu0 %v384_v1, %s3358_s20  ;;  %389 = vst.msk [vmem:[#allocation2] ss:$8 sm:$0xf] %vm3556_vm0, %v384_v1  ;;  %390 = vst.msk [vmem:[#allocation2] ss:$8 sm:$0x70] %vm3556_vm0, %v384_v1 }
  0x59   : > { %p4434_p1 = scmp.ne.s32.totalorder %s4418_s23, 0 }
  0x5c   : > { %419 = vrot.lane.b32.xlu1 %v384_v1, %s3359_s21  ;;  %401 = vrot.lane.b32.xlu0 %v384_v1, %s3360_s26 }
  0x60   : > { %437 = vrot.lane.b32.xlu1 %v384_v1, %s3361_s29  ;;  %428 = vrot.lane.b32.xlu0 %v384_v1, %s3362_s27  ;;  %s3369_s29 = smov 111  }
  0x64   : > { %455 = vrot.lane.b32.xlu1 %v384_v1, %s3363_s15  ;;  %446 = vrot.lane.b32.xlu0 %v384_v1, %s3364_s19  ;;  %s3370_s15 = smov 110   ;;  %s3371_s19 = smov 95  }
  0x68   : > { %484 = vperm.xlu0 %3171, %v480_v4   ;;  %489 = vperm.xlu1 %3172, %v481_v5  }
  0xca   : > { %v411_v7 = vpop.permute.xlu1 %410  ;;  %v393_v8 = vpop.permute.xlu0 %392 }
  0xcb   : > { %v412_v9 = vrot.slane %v411_v7, 1  ;;  %v394_v10 = vrot.slane %v393_v8, 1 }
  0xcd   : > { %v414_v11 = vsel %vm413_vm1, %v411_v7, %v412_v9  ;;  %v396_v12 = vsel %vm395_vm2, %v393_v8, %v394_v10 }
  0xce   : > { %417 = vst.msk [vmem:[#allocation2 + $0x3] ss:$8 sm:$0xf] %vm3556_vm0, %v414_v11  ;;  %418 = vst.msk [vmem:[#allocation2 + $0x3] ss:$8 sm:$0x70] %vm3556_vm0, %v414_v11  ;;  %v420_v13 = vpop.permute.xlu1 %419  ;;  %v402_v14 = vpop.permute.xlu0 %401 }
  0xcf   : > { %399 = vst.msk [vmem:[#allocation2 + $0x1] ss:$8 sm:$0xf] %vm3556_vm0, %v396_v12  ;;  %400 = vst.msk [vmem:[#allocation2 + $0x1] ss:$8 sm:$0x70] %vm3556_vm0, %v396_v12 }
  0xd0   : > { %v421_v15 = vrot.slane %v420_v13, 1  ;;  %v403_v16 = vrot.slane %v402_v14, 1 }
  0xd2   : > { %v423_v17 = vsel %vm422_vm3, %v420_v13, %v421_v15  ;;  %v405_v18 = vsel %vm404_vm4, %v402_v14, %v403_v16  ;;  %v438_v19 = vpop.permute.xlu1 %437  ;;  %v429_v20 = vpop.permute.xlu0 %428  ;;  %vm1601_vm3 = vcmask 908288  }
  0xd3   : > { %426 = vst.msk [vmem:[#allocation2 + $0x4] ss:$8 sm:$0xf] %vm3556_vm0, %v423_v17  ;;  %427 = vst.msk [vmem:[#allocation2 + $0x4] ss:$8 sm:$0x70] %vm3556_vm0, %v423_v17 }
  0xd4   : > { %408 = vst.msk [vmem:[#allocation2 + $0x2] ss:$8 sm:$0xf] %vm3556_vm0, %v405_v18  ;;  %409 = vst.msk [vmem:[#allocation2 + $0x2] ss:$8 sm:$0x70] %vm3556_vm0, %v405_v18 }
  0xd5   : > { %v439_v21 = vrot.slane %v438_v19, 1  ;;  %v430_v22 = vrot.slane %v429_v20, 1 }
  0xd6   : > { %v456_v25 = vpop.permute.xlu1 %455  ;;  %v447_v26 = vpop.permute.xlu0 %446 }
  0xd7   : > { %v441_v23 = vsel %vm440_vm5, %v438_v19, %v439_v21  ;;  %v432_v24 = vsel %vm431_vm6, %v429_v20, %v430_v22  ;;  %v457_v27 = vrot.slane %v456_v25, 1  ;;  %v448_v28 = vrot.slane %v447_v26, 1 }
  0xd8   : > { %444 = vst.msk [vmem:[#allocation2 + $0x6] ss:$8 sm:$0xf] %vm3556_vm0, %v441_v23  ;;  %445 = vst.msk [vmem:[#allocation2 + $0x6] ss:$8 sm:$0x70] %vm3556_vm0, %v441_v23 }
  0xd9   : > { %435 = vst.msk [vmem:[#allocation2 + $0x5] ss:$8 sm:$0xf] %vm3556_vm0, %v432_v24  ;;  %436 = vst.msk [vmem:[#allocation2 + $0x5] ss:$8 sm:$0x70] %vm3556_vm0, %v432_v24  ;;  %v459_v29 = vsel %vm458_vm7, %v456_v25, %v457_v27  ;;  %v450_v30 = vsel %vm449_vm8, %v447_v26, %v448_v28 }
  0xda   : > { %462 = vst.msk [vmem:[#allocation2 + $0x38] ss:$8 sm:$0xf] %vm3556_vm0, %v459_v29  ;;  %463 = vst.msk [vmem:[#allocation2 + $0x38] ss:$8 sm:$0x70] %vm3556_vm0, %v459_v29 }
  0xdb   : > { %453 = vst.msk [vmem:[#allocation2 + $0x7] ss:$8 sm:$0xf] %vm3556_vm0, %v450_v30  ;;  %454 = vst.msk [vmem:[#allocation2 + $0x7] ss:$8 sm:$0x70] %vm3556_vm0, %v450_v30 }
  0xdc   : > { %v1006_v28 = vld [vmem:[#allocation4 + $0x8] sm:$0xff]  ;;  %v1008_v29 = vld [vmem:[#allocation4 + $0x18] sm:$0xff]  ;;  %v1005_v30 = vld [vmem:[#allocation4] sm:$0xff]  ;;  %vm1754_vm0 = vcmask 130048   ;;  %vm1620_vm5 = vcmask 900096   ;;  %vm1657_vm7 = vcmask 777216  }
  0xdd   : > { %v2703_v31 = vpack.c.bf16 %v1008_v29, %v1006_v28  ;;  %v1029_v28 = vld [vmem:[#allocation4 + $0xc0] sm:$0xff]  ;;  %v1031_v29 = vld [vmem:[#allocation4 + $0xd0] sm:$0xff]  ;;  %vm2030_vm8 = vcmask 629760  }
  0xe1   : > { %v474_v33 = vld [vmem:[#allocation2 + $0x40] sm:$0x1]  ;;  %v473_v38 = vld [vmem:[#allocation2 + $0x38] sm:$0x1]  ;;  %v476_v45 = vld [vmem:[#allocation2 + $0x50] sm:$0x1] }
  0xe2   : > { %v467_v32 = vld [vmem:[#allocation2 + $0x8] sm:$0xff]  ;;  %v478_v36 = vld [vmem:[#allocation2 + $0x60] sm:$0x1]  ;;  %v477_v42 = vld [vmem:[#allocation2 + $0x58] sm:$0x1] }
  0xe3   : > { %v471_v34 = vld [vmem:[#allocation2 + $0x28] sm:$0xff]  ;;  %v2679_v35 = vpack.c.bf16 %v474_v33, %v467_v32  ;;  %v466_v37 = vld [vmem:[#allocation2] sm:$0xff]  ;;  %v469_v43 = vld [vmem:[#allocation2 + $0x18] sm:$0xff] }
  0xe4   : > { %v2691_v39 = vpack.c.bf16 %v478_v36, %v471_v34  ;;  %v2682_v40 = vpack.c.bf16 %v473_v38, %v466_v37  ;;  %v470_v41 = vld [vmem:[#allocation2 + $0x20] sm:$0xff]  ;;  %v468_v46 = vld [vmem:[#allocation2 + $0x10] sm:$0xff]  ;;  %v475_v47 = vld [vmem:[#allocation2 + $0x48] sm:$0x1]  ;;  %v2685_v48 = vpack.c.bf16 %v476_v45, %v469_v43 }
  0xe5   : > { %2681 = vmatprep.subr.msk.bf16.mxu1 %vm3613_vm11, %v2679_v35  ;;  %v2694_v44 = vpack.c.bf16 %v477_v42, %v470_v41  ;;  %v472_v50 = vld [vmem:[#allocation2 + $0x30] sm:$0xff]  ;;  %v479_v51 = vld [vmem:[#allocation2 + $0x68] sm:$0x1]  ;;  %v2688_v52 = vpack.c.bf16 %v475_v47, %v468_v46  ;;  %v1007_v32 = vld [vmem:[#allocation4 + $0x10] sm:$0xff] }
  0xe6   : > { %2693 = vmatprep.subr.msk.bf16.mxu0 %vm3613_vm11, %v2691_v39  ;;  %2684 = vmatpush1.bf16.msk.msra.mxu1 %vm3613_vm11, %v2682_v40  ;;  %v2697_v53 = vpack.c.bf16 %v479_v51, %v472_v50  ;;  %v1010_v33 = vld [vmem:[#allocation4 + $0x28] sm:$0xff]  ;;  %v1012_v34 = vld [vmem:[#allocation4 + $0x38] sm:$0xff]  ;;  %v2705_v35 = vpack.c.bf16 %v1007_v32, %v1005_v30  ;;  %v1009_v37 = vld [vmem:[#allocation4 + $0x20] sm:$0xff]  ;;  %v2729_v32 = vpack.c.bf16 %v1031_v29, %v1029_v28 }
  0xe7   : > { %2696 = vmatpush1.bf16.msk.msra.mxu0 %vm3613_vm11, %v2694_v44  ;;  %2687 = vmatprep.subr.msk.bf16.mxu1 %vm3613_vm11, %v2685_v48  ;;  %v3655_v59 = vpop.permute.xlu0 %484  ;;  %v3664_v1 = vpop.permute.xlu1 %489  ;;  %v2707_v36 = vpack.c.bf16 %v1012_v34, %v1010_v33  ;;  %v1011_v38 = vld [vmem:[#allocation4 + $0x30] sm:$0xff]  ;;  %v1014_v39 = vld [vmem:[#allocation4 + $0x48] sm:$0xff]  ;;  %v1016_v40 = vld [vmem:[#allocation4 + $0x58] sm:$0xff] }
  0xe8   : > { %2704 = vmatprep.subr.bf16.mxu0 %v2703_v31  ;;  %v2709_v41 = vpack.c.bf16 %v1011_v38, %v1009_v37  ;;  %v2711_v42 = vpack.c.bf16 %v1016_v40, %v1014_v39  ;;  %v1013_v43 = vld [vmem:[#allocation4 + $0x40] sm:$0xff]  ;;  %v1015_v44 = vld [vmem:[#allocation4 + $0x50] sm:$0xff]  ;;  %v1018_v45 = vld [vmem:[#allocation4 + $0x68] sm:$0xff] }
  0xe9   : > { %2569 = vmatmul.mubr.msk.f32.vlgmr.msra.gmra.mrb[0].mxu1 %vm492_vm12, %v464_v49  ;;  %v1020_v46 = vld [vmem:[#allocation4 + $0x78] sm:$0xff]  ;;  %v2713_v47 = vpack.c.bf16 %v1015_v44, %v1013_v43  ;;  %v1019_v50 = vld [vmem:[#allocation4 + $0x70] sm:$0xff]  ;;  %v1022_v51 = vld [vmem:[#allocation4 + $0x88] sm:$0xff] }
  0xea   : > { %2690 = vmatpush1.bf16.msk.msra.mxu1 %vm3613_vm11, %v2688_v52  ;;  %591 = vmatprep.mubr.f32.mxu1 %v3365_v3  ;;  %v2715_v48 = vpack.c.bf16 %v1020_v46, %v1018_v45  ;;  %v1024_v52 = vld [vmem:[#allocation4 + $0x98] sm:$0xff]  ;;  %v1034_v30 = vld [vmem:[#allocation4 + $0xe8] sm:$0xff]  ;;  %v1033_v34 = vld [vmem:[#allocation4 + $0xe0] sm:$0xff] }
  0xeb   : > { %2699 = vmatprep.subr.msk.bf16.mxu1 %vm3613_vm11, %v2697_v53  ;;  %2577 = vmatmul.mubr.msk.f32.vlgmr.msra.gmra.mrb[0].mxu0 %vm492_vm12, %v464_v49  ;;  %v1036_v31 = vld [vmem:[#allocation4 + $0xf8] sm:$0xff]  ;;  %v1037_v40 = vld [vmem:[#allocation4 + $0x100] sm:$0xff] }
  0xec   : > { %745 = vmatprep.mubr.f32.mxu0 %v3365_v3  ;;  %2706 = vmatpush1.bf16.msra.mxu0 %v2705_v35  ;;  %v2731_v33 = vpack.c.bf16 %v1036_v31, %v1034_v30  ;;  %v1035_v35 = vld [vmem:[#allocation4 + $0xf0] sm:$0xff]  ;;  %v1040_v37 = vld [vmem:[#allocation4 + $0x118] sm:$0xff]  ;;  %v1041_v46 = vld [vmem:[#allocation4 + $0x120] sm:$0xff] }
  0xed   : > { %2570 = vmatmul.mubr.msk.f32.gmra.mrb[2].mxu1 %vm492_vm12, %v465_v54  ;;  %2708 = vmatprep.subr.bf16.mxu0 %v2707_v36  ;;  %v1038_v36 = vld [vmem:[#allocation4 + $0x108] sm:$0xff]  ;;  %v2733_v38 = vpack.c.bf16 %v1035_v35, %v1033_v34  ;;  %v1044_v43 = vld [vmem:[#allocation4 + $0x138] sm:$0xff]  ;;  %v1057_v31 = vld [vmem:[#allocation4 + $0x1a0] sm:$0xff] }
  0xee   : > { %662 = vmatprep.mubr.f32.mxu1 %v3365_v3  ;;  %v2735_v39 = vpack.c.bf16 %v1040_v37, %v1038_v36  ;;  %v1060_v28 = vld [vmem:[#allocation4 + $0x1b8] sm:$0xff]  ;;  %v1062_v34 = vld [vmem:[#allocation4 + $0x1c8] sm:$0xff]  ;;  %v1061_v36 = vld [vmem:[#allocation4 + $0x1c0] sm:$0xff] }
  0xef   : > { %2578 = vmatmul.mubr.msk.f32.gmra.mrb[2].mxu0 %vm492_vm12, %v465_v54  ;;  %v1064_v35 = vld [vmem:[#allocation4 + $0x1d8] sm:$0xff] }
  0xf0   : > { %2710 = vmatpush1.bf16.msra.mxu0 %v2709_v41  ;;  %v1039_v41 = vld [vmem:[#allocation4 + $0x110] sm:$0xff]  ;;  %v2759_v37 = vpack.c.bf16 %v1064_v35, %v1062_v34  ;;  %v1069_v34 = vld [vmem:[#allocation4 + $0x200] sm:$0xff] }
  0xf1   : > { %2573 = vmatmul.mubr.msk.f32.vlgmr.msra.gmra.mrb[4].mxu1 %vm492_vm12, %v464_v49  ;;  %2712 = vmatprep.subr.bf16.mxu0 %v2711_v42  ;;  %v1042_v42 = vld [vmem:[#allocation4 + $0x128] sm:$0xff]  ;;  %v2737_v44 = vpack.c.bf16 %v1039_v41, %v1037_v40  ;;  %v1068_v41 = vld [vmem:[#allocation4 + $0x1f8] sm:$0xff]  ;;  %v1071_v35 = vld [vmem:[#allocation4 + $0x210] sm:$0xff] }
  0xf2   : > { %2702 = vmatpush3.bf16.msk.msra.mxu1 %vm3613_vm11, %v2697_v53  ;;  %668 = vmatprep.mubr.f32.mxu1 %v3365_v3  ;;  %v2739_v45 = vpack.c.bf16 %v1044_v43, %v1042_v42  ;;  %v1066_v40 = vld [vmem:[#allocation4 + $0x1e8] sm:$0xff]  ;;  %v1065_v42 = vld [vmem:[#allocation4 + $0x1e0] sm:$0xff] }
  0xf4   : > { %2714 = vmatpush1.bf16.msra.mxu0 %v2713_v47  ;;  %v1043_v47 = vld [vmem:[#allocation4 + $0x130] sm:$0xff] }
  0xf5   : > { %2574 = vmatmul.mubr.msk.f32.gmra.mrb[6].mxu1 %vm492_vm12, %v465_v54  ;;  %2716 = vmatprep.subr.bf16.mxu0 %v2715_v48  ;;  %v1046_v48 = vld [vmem:[#allocation4 + $0x148] sm:$0xff] }
  0xf6   : > { %2657 = vmatprep.mubr.msk.f32.mxu1 %vm492_vm12, %v464_v49  ;;  %v1017_v49 = vld [vmem:[#allocation4 + $0x60] sm:$0xff] }
  0xf7   : > { %v2717_v53 = vpack.c.bf16 %v1019_v50, %v1017_v49  ;;  %v1048_v49 = vld [vmem:[#allocation4 + $0x158] sm:$0xff]  ;;  %v2741_v50 = vpack.c.bf16 %v1043_v47, %v1041_v46 }
  0xf9   : > { %2658 = vmatmul.mubr.msk.f32.vlgmr.msra.gmra.mrb[8].mxu1 %vm492_vm12, %v465_v54  ;;  %v2719_v54 = vpack.c.bf16 %v1024_v52, %v1022_v51  ;;  %2718 = vmatpush1.bf16.msra.mxu0 %v2717_v53  ;;  %v2743_v51 = vpack.c.bf16 %v1048_v49, %v1046_v48  ;;  %v1045_v52 = vld [vmem:[#allocation4 + $0x140] sm:$0xff]  ;;  %v1047_v53 = vld [vmem:[#allocation4 + $0x150] sm:$0xff] }
  0xfb   : > { %2720 = vmatprep.subr.bf16.mxu0 %v2719_v54  ;;  %v1050_v54 = vld [vmem:[#allocation4 + $0x168] sm:$0xff] }
 0x1bc   : > { %v587_v55 = vpop.f32.mrb[0].mxu1 }
 0x1bd   : > { %v589_v56 = vpop.f32.mrb[1].mxu1  ;;  %v3667_v4 = vadd.f32 %v587_v55, %v3655_v59  ;;  %v1021_v55 = vld [vmem:[#allocation4 + $0x80] sm:$0xff] }
 0x1be   : > { %v3651_v57 = vpop.f32.mrb[0].mxu0  ;;  %v3660_v63 = vadd.f32 %v589_v56, %v3655_v59  ;;  %v1023_v56 = vld [vmem:[#allocation4 + $0x90] sm:$0xff] }
 0x1bf   : > { %v3653_v58 = vpop.f32.mrb[1].mxu0  ;;  %v827_v11 = vmax.f32 %v3667_v4, 0.0 }
 0x1c0   : > { %v593_v60 = vpop.f32.mrb[2].mxu1  ;;  %v828_v8 = vmax.f32 %v3660_v63, 0.0 }
 0x1c1   : > { %v595_v61 = vpop.f32.mrb[3].mxu1  ;;  %v3683_v14 = vadd.f32 %v593_v60, %v3664_v1  ;;  %v1026_v60 = vld [vmem:[#allocation4 + $0xa8] sm:$0xff] }
 0x1c2   : > { %v3657_v62 = vpop.f32.mrb[2].mxu0  ;;  %v3677_v9 = vadd.f32 %v595_v61, %v3664_v1  ;;  %v1028_v61 = vld [vmem:[#allocation4 + $0xb8] sm:$0xff] }
 0x1c3   : > { %v3662_v0 = vpop.f32.mrb[3].mxu0  ;;  %v834_v22 = vmax.f32 %v3683_v14, 0.0  ;;  %v3751_v63 = vadd.f32 %v3657_v62, %v3664_v1 }
 0x1c4   : > { %v664_v2 = vpop.f32.mrb[4].mxu1  ;;  %v835_v20 = vmax.f32 %v3677_v9, 0.0 }
 0x1c5   : > { %v3670_v5 = vadd.f32 %v664_v2, %v3655_v59  ;;  %v666_v6 = vpop.f32.mrb[5].mxu1  ;;  %v2721_v2 = vpack.c.bf16 %v1023_v56, %v1021_v55  ;;  %v1052_v55 = vld [vmem:[#allocation4 + $0x178] sm:$0xff]  ;;  %v2745_v56 = vpack.c.bf16 %v1047_v53, %v1045_v52 }
 0x1c6   : > { %v3673_v7 = vadd.f32 %v666_v6, %v3655_v59  ;;  %v2723_v6 = vpack.c.bf16 %v1028_v61, %v1026_v60  ;;  %v2747_v60 = vpack.c.bf16 %v1052_v55, %v1050_v54  ;;  %v1049_v61 = vld [vmem:[#allocation4 + $0x160] sm:$0xff] }
 0x1c7   : > { %v829_v10 = vmax.f32 %v3670_v5, 0.0  ;;  %2722 = vmatpush1.bf16.msra.mxu0 %v2721_v2  ;;  %v1051_v2 = vld [vmem:[#allocation4 + $0x170] sm:$0xff] }
 0x1c8   : > { %v830_v12 = vmax.f32 %v3673_v7, 0.0  ;;  %v670_v13 = vpop.f32.mrb[6].mxu1  ;;  %2724 = vmatprep.subr.bf16.mxu0 %v2723_v6  ;;  %v1054_v6 = vld [vmem:[#allocation4 + $0x188] sm:$0xff]  ;;  %v1079_v7 = vld [vmem:[#allocation4 + $0x250] sm:$0xff] }
 0x1c9   : > { %v3173_v15 = vpack.i.bf16 %v829_v10, %v828_v8  ;;  %v3690_v16 = vadd.f32 %v670_v13, %v3664_v1  ;;  %v672_v17 = vpop.f32.mrb[7].mxu1  ;;  %v1025_v13 = vld [vmem:[#allocation4 + $0xa0] sm:$0xff] }
 0x1ca   : > { %v3178_v18 = vpack.i.bf16 %v827_v11, %v830_v12  ;;  %v3697_v19 = vadd.f32 %v672_v17, %v3664_v1  ;;  %v1030_v17 = vld [vmem:[#allocation4 + $0xc8] sm:$0xff] }
 0x1cb   : > { %v836_v21 = vmax.f32 %v3690_v16, 0.0  ;;  %3174 = vrot.lane.b32.xlu1 %v3173_v15, %s3358_s20  ;;  %v1027_v15 = vld [vmem:[#allocation4 + $0xb0] sm:$0xff] }
 0x1cc   : > { %v837_v23 = vmax.f32 %v3697_v19, 0.0  ;;  %v3704_v24 = vpop.f32.mrb[8].mxu1  ;;  %3179 = vrot.lane.b32.xlu0 %v3178_v18, %s3358_s20  ;;  %v1032_v18 = vld [vmem:[#allocation4 + $0xd8] sm:$0xff] }
 0x1cd   : > { %v3183_v25 = vpack.i.bf16 %v836_v21, %v835_v20  ;;  %v3711_v26 = vpop.f32.mrb[9].mxu1 }
 0x1ce   : > { %v3188_v27 = vpack.i.bf16 %v834_v22, %v837_v23  ;;  %v3781_v9 = vadd.f32 %v3711_v26, %v3655_v59 }
 0x1cf   : > { %3184 = vrot.lane.b32.xlu1 %v3183_v25, %s3358_s20  ;;  %v2725_v25 = vpack.c.bf16 %v1027_v15, %v1025_v13  ;;  %v1056_v13 = vld [vmem:[#allocation4 + $0x198] sm:$0xff]  ;;  %v2749_v15 = vpack.c.bf16 %v1051_v2, %v1049_v61 }
 0x1d0   : > { %3189 = vrot.lane.b32.xlu0 %v3188_v27, %s3358_s20  ;;  %v2727_v27 = vpack.c.bf16 %v1032_v18, %v1030_v17  ;;  %v2751_v17 = vpack.c.bf16 %v1056_v13, %v1054_v6  ;;  %v1053_v18 = vld [vmem:[#allocation4 + $0x180] sm:$0xff] }
 0x1d1   : > { %2726 = vmatpush1.bf16.msra.mxu0 %v2725_v25  ;;  %v1055_v25 = vld [vmem:[#allocation4 + $0x190] sm:$0xff] }
 0x1d2   : > { %2728 = vmatprep.subr.bf16.mxu0 %v2727_v27  ;;  %v1058_v27 = vld [vmem:[#allocation4 + $0x1a8] sm:$0xff]  ;;  %v2753_v29 = vpack.c.bf16 %v1055_v25, %v1053_v18  ;;  %v838_v25 = vmax.f32 %v3751_v63, 0.0 }
 0x1d3   : > { %v2755_v30 = vpack.c.bf16 %v1060_v28, %v1058_v27 }
 0x1d5   : > { %2730 = vmatpush1.bf16.msra.mxu0 %v2729_v32  ;;  %v1059_v32 = vld [vmem:[#allocation4 + $0x1b0] sm:$0xff] }
 0x1d6   : > { %2732 = vmatprep.subr.bf16.mxu0 %v2731_v33  ;;  %v2757_v33 = vpack.c.bf16 %v1059_v32, %v1057_v31 }
 0x1d9   : > { %2734 = vmatpush1.bf16.msra.mxu0 %v2733_v38  ;;  %v1063_v38 = vld [vmem:[#allocation4 + $0x1d0] sm:$0xff] }
 0x1da   : > { %2736 = vmatprep.subr.bf16.mxu0 %v2735_v39  ;;  %v2761_v39 = vpack.c.bf16 %v1063_v38, %v1061_v36  ;;  %v1074_v36 = vld [vmem:[#allocation4 + $0x228] sm:$0xff] }
 0x1dd   : > { %2738 = vmatpush1.bf16.msra.mxu0 %v2737_v44  ;;  %v2763_v44 = vpack.c.bf16 %v1068_v41, %v1066_v40 }
 0x1de   : > { %2740 = vmatprep.subr.bf16.mxu0 %v2739_v45  ;;  %v1067_v45 = vld [vmem:[#allocation4 + $0x1f0] sm:$0xff] }
 0x1df   : > { %v2765_v49 = vpack.c.bf16 %v1067_v45, %v1065_v42  ;;  %v2769_v45 = vpack.c.bf16 %v1071_v35, %v1069_v34  ;;  %v1083_v34 = vld [vmem:[#allocation4 + $0x270] sm:$0xff]  ;;  %v1088_v35 = vld [vmem:[#allocation4 + $0x298] sm:$0xff] }
 0x1e1   : > { %2742 = vmatpush1.bf16.msra.mxu0 %v2741_v50  ;;  %v3723_v50 = vadd.f32 %v3651_v57, %v3655_v59 }
 0x1e2   : > { %2744 = vmatprep.subr.bf16.mxu0 %v2743_v51  ;;  %v3727_v51 = vadd.f32 %v3653_v58, %v3655_v59 }
 0x1e5   : > { %2746 = vmatpush1.bf16.msra.mxu0 %v2745_v56 }
 0x1e6   : > { %2748 = vmatprep.subr.bf16.mxu0 %v2747_v60 }
 0x1e9   : > { %2750 = vmatpush1.bf16.msra.mxu0 %v2749_v15  ;;  %v831_v15 = vmax.f32 %v3723_v50, 0.0 }
 0x1ea   : > { %2752 = vmatprep.subr.bf16.mxu0 %v2751_v17  ;;  %v832_v17 = vmax.f32 %v3727_v51, 0.0 }
 0x1ed   : > { %2754 = vmatpush1.bf16.msra.mxu0 %v2753_v29  ;;  %v1072_v29 = vld [vmem:[#allocation4 + $0x218] sm:$0xff] }
 0x1ee   : > { %2756 = vmatprep.subr.bf16.mxu0 %v2755_v30 }
 0x1f1   : > { %2758 = vmatpush1.bf16.msra.mxu0 %v2757_v33 }
 0x1f2   : > { %2760 = vmatprep.subr.bf16.mxu0 %v2759_v37  ;;  %v1076_v37 = vld [vmem:[#allocation4 + $0x238] sm:$0xff] }
 0x1f5   : > { %2762 = vmatpush1.bf16.msra.mxu0 %v2761_v39 }
 0x1f6   : > { %2764 = vmatprep.subr.bf16.mxu0 %v2763_v44 }
 0x1f9   : > { %2766 = vmatpush1.bf16.msra.mxu0 %v2765_v49 }
 0x23d   : > { %v3175_v43 = vpop.permute.xlu1 %3174 }
 0x23e   : > { %v3177_v46 = vunpack.i.h.bf16 %v3175_v43  ;;  %v3176_v47 = vunpack.i.l.bf16 %v3175_v43  ;;  %v3719_v48 = vpop.permute.xlu0 %3179 }
 0x23f   : > { %v3182_v52 = vunpack.i.h.bf16 %v3719_v48  ;;  %v3181_v53 = vunpack.i.l.bf16 %v3719_v48 }
 0x240   : > { %v884_v54 = vsel %vm395_vm2, %v3176_v47, %v3177_v46 }
 0x241   : > { %v885_v55 = vsel %vm395_vm2, %v3177_v46, %v3181_v53  ;;  %v3185_v56 = vpop.permute.xlu1 %3184  ;;  %v883_v57 = vsel %vm395_vm2, %v3182_v52, %v3176_v47  ;;  %v910_v60 = vmax.f32 %v828_v8, %v884_v54  ;;  %v3755_v8 = vadd.f32 %v3662_v0, %v3664_v1  ;;  %v1073_v54 = vld [vmem:[#allocation4 + $0x220] sm:$0xff] }
 0x242   : > { %v3187_v58 = vunpack.i.h.bf16 %v3185_v56  ;;  %v3186_v61 = vunpack.i.l.bf16 %v3185_v56  ;;  %v3738_v2 = vpop.permute.xlu0 %3189  ;;  %v909_v6 = vmax.f32 %v827_v11, %v883_v57  ;;  %v3744_v13 = vmax.f32 %v829_v10, %v885_v55  ;;  %v1075_v55 = vld [vmem:[#allocation4 + $0x230] sm:$0xff]  ;;  %v1078_v56 = vld [vmem:[#allocation4 + $0x248] sm:$0xff]  ;;  %v1080_v57 = vld [vmem:[#allocation4 + $0x258] sm:$0xff] }
 0x243   : > { %v3191_v18 = vunpack.i.l.bf16 %v3738_v2  ;;  %v3198_v0 = vpack.i.bf16 %v832_v17, %v831_v15  ;;  %v839_v27 = vmax.f32 %v3755_v8, 0.0  ;;  %v3192_v59 = vunpack.i.h.bf16 %v3738_v2  ;;  %v1141_v8 = vld [vmem:[#allocation4 + $0x440] sm:$0xff] }
 0x244   : > { %v890_v4 = vsel %vm395_vm2, %v3186_v61, %v3187_v58  ;;  %937 = vrot.lane.b32.xlu0 %v909_v6, %s3357_s18  ;;  %v3193_v5 = vpack.i.bf16 %v3744_v13, %v910_v60  ;;  %v2771_v52 = vpack.c.bf16 %v1076_v37, %v1074_v36  ;;  %v2773_v48 = vpack.c.bf16 %v1075_v55, %v1073_v54  ;;  %v1085_v36 = vld [vmem:[#allocation4 + $0x280] sm:$0xff]  ;;  %v1087_v37 = vld [vmem:[#allocation4 + $0x290] sm:$0xff] }
 0x245   : > { %v891_v10 = vsel %vm395_vm2, %v3187_v58, %v3191_v18  ;;  %v917_v11 = vmax.f32 %v835_v20, %v890_v4  ;;  %v3213_v16 = vpack.i.bf16 %v839_v27, %v838_v25  ;;  %v833_v20 = vmax.f32 %v3781_v9, 0.0  ;;  %v1093_v55 = vld [vmem:[#allocation4 + $0x2c0] sm:$0xff] }
 0x246   : > { %3194 = vrot.lane.b32.xlu1 %v3193_v5, %s3357_s18  ;;  %v3768_v62 = vmax.f32 %v836_v21, %v891_v10  ;;  %v1070_v21 = vld [vmem:[#allocation4 + $0x208] sm:$0xff]  ;;  %v889_v40 = vsel %vm395_vm2, %v3192_v59, %v3186_v61 }
 0x247   : > { %v2767_v30 = vpack.c.bf16 %v1072_v29, %v1070_v21  ;;  %v3822_v10 = vmax.f32 %v834_v22, %v889_v40  ;;  %v1082_v21 = vld [vmem:[#allocation4 + $0x268] sm:$0xff]  ;;  %v1084_v29 = vld [vmem:[#allocation4 + $0x278] sm:$0xff] }
 0x248   : > { %v3208_v28 = vpack.i.bf16 %v3768_v62, %v917_v11  ;;  %v2779_v19 = vpack.c.bf16 %v1084_v29, %v1082_v21  ;;  %v1092_v40 = vld [vmem:[#allocation4 + $0x2b8] sm:$0xff]  ;;  %v1105_v21 = vld [vmem:[#allocation4 + $0x320] sm:$0xff]  ;;  %v1107_v29 = vld [vmem:[#allocation4 + $0x330] sm:$0xff] }
 0x249   : > { %2768 = vmatprep.subr.bf16.mxu0 %v2767_v30 }
 0x24a   : > { %3209 = vrot.lane.b32.xlu0 %v3208_v28, %s3357_s18  ;;  %3199 = vrot.lane.b32.xlu1 %v3198_v0, %s3358_s20  ;;  %v2775_v28 = vpack.c.bf16 %v1080_v57, %v1078_v56  ;;  %v1095_v56 = vld [vmem:[#allocation4 + $0x2d0] sm:$0xff]  ;;  %v1098_v57 = vld [vmem:[#allocation4 + $0x2e8] sm:$0xff] }
 0x24b   : > { %v2793_v51 = vpack.c.bf16 %v1095_v56, %v1093_v55  ;;  %v1123_v55 = vld [vmem:[#allocation4 + $0x3b0] sm:$0xff]  ;;  %v1126_v56 = vld [vmem:[#allocation4 + $0x3c8] sm:$0xff] }
 0x24e   : > { %3214 = vrot.lane.b32.xlu0 %v3213_v16, %s3358_s20  ;;  %v1077_v16 = vld [vmem:[#allocation4 + $0x240] sm:$0xff] }
 0x24f   : > { %v2777_v2 = vpack.c.bf16 %v1079_v7, %v1077_v16  ;;  %v1103_v16 = vld [vmem:[#allocation4 + $0x310] sm:$0xff]  ;;  %v1106_v7 = vld [vmem:[#allocation4 + $0x328] sm:$0xff] }
 0x252   : > { %867 = vrot.lane.b32.xlu0 %v833_v20, %s3358_s20 }
 0x2b6   : > { %v938_v26 = vpop.permute.xlu0 %937 }
 0x2b8   : > { %v3793_v31 = vpop.permute.xlu1 %3194 }
 0x2b9   : > { %v3197_v32 = vunpack.i.h.bf16 %v3793_v31  ;;  %v3196_v33 = vunpack.i.l.bf16 %v3793_v31 }
 0x2bb   : > { %v965_v38 = vsel %vm413_vm1, %v938_v26, %v3196_v33  ;;  %v966_v39 = vsel %vm413_vm1, %v3196_v33, %v3197_v32 }
 0x2bc   : > { %v991_v41 = vmax.f32 %v909_v6, %v965_v38  ;;  %v3802_v42 = vpop.permute.xlu0 %3209  ;;  %v3200_v43 = vpop.permute.xlu1 %3199  ;;  %v992_v44 = vmax.f32 %v910_v60, %v966_v39  ;;  %v1090_v39 = vld [vmem:[#allocation4 + $0x2a8] sm:$0xff] }
 0x2bd   : > { %v3212_v46 = vunpack.i.h.bf16 %v3802_v42  ;;  %v3211_v47 = vunpack.i.l.bf16 %v3802_v42  ;;  %v3201_v49 = vunpack.i.l.bf16 %v3200_v43  ;;  %v3202_v58 = vunpack.i.h.bf16 %v3200_v43  ;;  %v1089_v43 = vld [vmem:[#allocation4 + $0x2a0] sm:$0xff] }
 0x2be   : > { %1285 = vmatprep.mubr.f32.mxu0 %v992_v44  ;;  %v1091_v44 = vld [vmem:[#allocation4 + $0x2b0] sm:$0xff] }
 0x2bf   : > { %v886_v61 = vsel %vm395_vm2, %v3181_v53, %v3201_v49  ;;  %1286 = vmatmul.mubr.f32.vlgmr.msra.gmra.mrb[4].mxu0 %v991_v41  ;;  %v972_v60 = vsel %vm413_vm1, %v3211_v47, %v3212_v46  ;;  %v887_v22 = vsel %vm395_vm2, %v3201_v49, %v3202_v58  ;;  %v2785_v41 = vpack.c.bf16 %v1087_v37, %v1085_v36  ;;  %v1096_v49 = vld [vmem:[#allocation4 + $0x2d8] sm:$0xff]  ;;  %v1113_v36 = vld [vmem:[#allocation4 + $0x360] sm:$0xff]  ;;  %v1115_v37 = vld [vmem:[#allocation4 + $0x370] sm:$0xff] }
 0x2c0   : > { %v3814_v6 = vpop.permute.xlu0 %3214  ;;  %v999_v4 = vmax.f32 %v917_v11, %v972_v60  ;;  %v3818_v5 = vmax.f32 %v830_v12, %v886_v61  ;;  %2770 = vmatpush1.bf16.msra.mxu0 %v2769_v45  ;;  %v3852_v33 = vmax.f32 %v831_v15, %v887_v22  ;;  %v1094_v45 = vld [vmem:[#allocation4 + $0x2c8] sm:$0xff]  ;;  %v1097_v61 = vld [vmem:[#allocation4 + $0x2e0] sm:$0xff]  ;;  %v1099_v60 = vld [vmem:[#allocation4 + $0x2f0] sm:$0xff] }
 0x2c1   : > { %v3217_v53 = vunpack.i.h.bf16 %v3814_v6  ;;  %v3216_v0 = vunpack.i.l.bf16 %v3814_v6  ;;  %2772 = vmatprep.subr.bf16.mxu0 %v2771_v52  ;;  %v2789_v52 = vpack.c.bf16 %v1091_v44, %v1089_v43  ;;  %v2791_v54 = vpack.c.bf16 %v1096_v49, %v1094_v45  ;;  %v1119_v43 = vld [vmem:[#allocation4 + $0x390] sm:$0xff]  ;;  %v1122_v44 = vld [vmem:[#allocation4 + $0x3a8] sm:$0xff]  ;;  %v1124_v45 = vld [vmem:[#allocation4 + $0x3b8] sm:$0xff] }
 0x2c2   : > { %1291 = vmatprep.mubr.f32.mxu0 %v999_v4  ;;  %v3203_v11 = vpack.i.bf16 %v3818_v5, %v3822_v10  ;;  %v1102_v4 = vld [vmem:[#allocation4 + $0x308] sm:$0xff] }
 0x2c3   : > { %v892_v12 = vsel %vm395_vm2, %v3191_v18, %v3216_v0  ;;  %v893_v14 = vsel %vm395_vm2, %v3216_v0, %v3217_v53  ;;  %v3846_v18 = vadd.f32 %v3704_v24, %v3664_v1  ;;  %v2797_v0 = vpack.c.bf16 %v1099_v60, %v1097_v61  ;;  %v1127_v61 = vld [vmem:[#allocation4 + $0x3d0] sm:$0xff]  ;;  %v1130_v60 = vld [vmem:[#allocation4 + $0x3e8] sm:$0xff] }
 0x2c4   : > { %3204 = vrot.lane.b32.xlu1 %v3203_v11, %s3357_s18  ;;  %v3838_v30 = vmax.f32 %v837_v23, %v892_v12  ;;  %v3842_v59 = vmax.f32 %v838_v25, %v893_v14  ;;  %2774 = vmatpush1.bf16.msra.mxu0 %v2773_v48  ;;  %v1081_v23 = vld [vmem:[#allocation4 + $0x260] sm:$0xff]  ;;  %v868_v63 = vpop.permute.xlu0 %867  ;;  %v1086_v25 = vld [vmem:[#allocation4 + $0x288] sm:$0xff]  ;;  %v1104_v48 = vld [vmem:[#allocation4 + $0x318] sm:$0xff] }
 0x2c5   : > { %2776 = vmatprep.subr.bf16.mxu0 %v2775_v28  ;;  %v2781_v1 = vpack.c.bf16 %v1083_v34, %v1081_v23  ;;  %v840_v24 = vmax.f32 %v3846_v18, 0.0  ;;  %v3860_v50 = vmax.f32 %v833_v20, %v868_v63  ;;  %v2783_v15 = vpack.c.bf16 %v1088_v35, %v1086_v25  ;;  %v1101_v11 = vld [vmem:[#allocation4 + $0x300] sm:$0xff]  ;;  %v1108_v12 = vld [vmem:[#allocation4 + $0x338] sm:$0xff]  ;;  %v1114_v25 = vld [vmem:[#allocation4 + $0x368] sm:$0xff] }
 0x2c6   : > { %v3218_v26 = vpack.i.bf16 %v3842_v59, %v3838_v30  ;;  %v888_v38 = vsel %vm395_vm2, %v3202_v58, %v868_v63  ;;  %v2787_v20 = vpack.c.bf16 %v1092_v40, %v1090_v39  ;;  %v1100_v58 = vld [vmem:[#allocation4 + $0x2f8] sm:$0xff]  ;;  %v2799_v28 = vpack.c.bf16 %v1104_v48, %v1102_v4  ;;  %v1109_v34 = vld [vmem:[#allocation4 + $0x340] sm:$0xff]  ;;  %v1111_v63 = vld [vmem:[#allocation4 + $0x350] sm:$0xff] }
 0x2c7   : > { %v3870_v9 = vmax.f32 %v832_v17, %v888_v38  ;;  %v2795_v17 = vpack.c.bf16 %v1100_v58, %v1098_v57  ;;  %v2801_v14 = vpack.c.bf16 %v1103_v16, %v1101_v11  ;;  %v2803_v22 = vpack.c.bf16 %v1108_v12, %v1106_v7  ;;  %v1116_v35 = vld [vmem:[#allocation4 + $0x378] sm:$0xff]  ;;  %v1118_v38 = vld [vmem:[#allocation4 + $0x388] sm:$0xff]  ;;  %v1131_v11 = vld [vmem:[#allocation4 + $0x3f0] sm:$0xff] }
 0x2c8   : > { %3219 = vrot.lane.b32.xlu0 %v3218_v26, %s3357_s18  ;;  %945 = vrot.lane.b32.xlu1 %v3852_v33, %s3357_s18  ;;  %v1112_v26 = vld [vmem:[#allocation4 + $0x358] sm:$0xff]  ;;  %v2813_v40 = vpack.c.bf16 %v1115_v37, %v1113_v36  ;;  %v1134_v16 = vld [vmem:[#allocation4 + $0x408] sm:$0xff] }
 0x2c9   : > { %2778 = vmatpush1.bf16.msra.mxu0 %v2777_v2  ;;  %v1110_v2 = vld [vmem:[#allocation4 + $0x348] sm:$0xff]  ;;  %v1120_v39 = vld [vmem:[#allocation4 + $0x398] sm:$0xff] }
 0x2ca   : > { %2780 = vmatprep.subr.bf16.mxu0 %v2779_v19  ;;  %v2805_v19 = vpack.c.bf16 %v1107_v29, %v1105_v21  ;;  %v2807_v23 = vpack.c.bf16 %v1112_v26, %v1110_v2  ;;  %v1128_v57 = vld [vmem:[#allocation4 + $0x3d8] sm:$0xff]  ;;  %v1138_v36 = vld [vmem:[#allocation4 + $0x428] sm:$0xff] }
 0x2cb   : > { %v1132_v4 = vld [vmem:[#allocation4 + $0x3f8] sm:$0xff] }
 0x2cc   : > { %949 = vrot.lane.b32.xlu0 %v3860_v50, %s3357_s18  ;;  %881 = vrot.lane.b32.xlu1 %v840_v24, %s3358_s20  ;;  %v1136_v7 = vld [vmem:[#allocation4 + $0x418] sm:$0xff] }
 0x2cd   : > { %2782 = vmatpush1.bf16.msra.mxu0 %v2781_v1  ;;  %v2809_v1 = vpack.c.bf16 %v1111_v63, %v1109_v34  ;;  %v1133_v34 = vld [vmem:[#allocation4 + $0x400] sm:$0xff]  ;;  %v1135_v63 = vld [vmem:[#allocation4 + $0x410] sm:$0xff]  ;;  %v1140_v37 = vld [vmem:[#allocation4 + $0x438] sm:$0xff] }
 0x2ce   : > { %2784 = vmatprep.subr.bf16.mxu0 %v2783_v15  ;;  %v2811_v15 = vpack.c.bf16 %v1116_v35, %v1114_v25 }
 0x2d0   : > { %947 = vrot.lane.b32.xlu1 %v3870_v9, %s3357_s18 }
 0x2d1   : > { %2786 = vmatpush1.bf16.msra.mxu0 %v2785_v41  ;;  %v2815_v41 = vpack.c.bf16 %v1120_v39, %v1118_v38  ;;  %v2833_v38 = vpack.c.bf16 %v1135_v63, %v1133_v34 }
 0x2d2   : > { %2788 = vmatprep.subr.bf16.mxu0 %v2787_v20  ;;  %v1117_v20 = vld [vmem:[#allocation4 + $0x380] sm:$0xff] }
 0x2d3   : > { %v2817_v49 = vpack.c.bf16 %v1119_v43, %v1117_v20  ;;  %v2835_v43 = vpack.c.bf16 %v1140_v37, %v1138_v36 }
 0x2d5   : > { %2790 = vmatpush1.bf16.msra.mxu0 %v2789_v52  ;;  %v2819_v52 = vpack.c.bf16 %v1124_v45, %v1122_v44  ;;  %v1144_v45 = vld [vmem:[#allocation4 + $0x458] sm:$0xff] }
 0x2d6   : > { %2792 = vmatprep.subr.bf16.mxu0 %v2791_v54  ;;  %v1121_v54 = vld [vmem:[#allocation4 + $0x3a0] sm:$0xff] }
 0x2d7   : > { %v2821_v58 = vpack.c.bf16 %v1123_v55, %v1121_v54 }
 0x2d9   : > { %2794 = vmatpush1.bf16.msra.mxu0 %v2793_v51  ;;  %v2823_v51 = vpack.c.bf16 %v1128_v57, %v1126_v56  ;;  %v1145_v57 = vld [vmem:[#allocation4 + $0x460] sm:$0xff] }
 0x2da   : > { %2796 = vmatprep.subr.bf16.mxu0 %v2795_v17  ;;  %v1125_v17 = vld [vmem:[#allocation4 + $0x3c0] sm:$0xff] }
 0x2db   : > { %v2825_v48 = vpack.c.bf16 %v1127_v61, %v1125_v17 }
 0x2dd   : > { %2798 = vmatpush1.bf16.msra.mxu0 %v2797_v0  ;;  %v2827_v0 = vpack.c.bf16 %v1132_v4, %v1130_v60  ;;  %v1149_v60 = vld [vmem:[#allocation4 + $0x480] sm:$0xff]  ;;  %v1151_v4 = vld [vmem:[#allocation4 + $0x490] sm:$0xff] }
 0x2de   : > { %2800 = vmatprep.subr.bf16.mxu0 %v2799_v28  ;;  %v1129_v28 = vld [vmem:[#allocation4 + $0x3e0] sm:$0xff] }
 0x2df   : > { %v2829_v12 = vpack.c.bf16 %v1131_v11, %v1129_v28  ;;  %v1153_v11 = vld [vmem:[#allocation4 + $0x4a0] sm:$0xff] }
 0x2e1   : > { %2802 = vmatpush1.bf16.msra.mxu0 %v2801_v14  ;;  %v2831_v14 = vpack.c.bf16 %v1136_v7, %v1134_v16  ;;  %v1155_v16 = vld [vmem:[#allocation4 + $0x4b0] sm:$0xff]  ;;  %v1158_v7 = vld [vmem:[#allocation4 + $0x4c8] sm:$0xff] }
 0x2e2   : > { %2804 = vmatprep.subr.bf16.mxu0 %v2803_v22 }
 0x2e5   : > { %2806 = vmatpush1.bf16.msra.mxu0 %v2805_v19 }
 0x2e6   : > { %2808 = vmatprep.subr.bf16.mxu0 %v2807_v23 }
 0x2e9   : > { %2810 = vmatpush1.bf16.msra.mxu0 %v2809_v1 }
 0x2ea   : > { %2812 = vmatprep.subr.bf16.mxu0 %v2811_v15 }
 0x2ed   : > { %2814 = vmatpush1.bf16.msra.mxu0 %v2813_v40  ;;  %v1137_v40 = vld [vmem:[#allocation4 + $0x420] sm:$0xff] }
 0x2ee   : > { %2816 = vmatprep.subr.bf16.mxu0 %v2815_v41  ;;  %v1139_v41 = vld [vmem:[#allocation4 + $0x430] sm:$0xff] }
 0x2ef   : > { %v2837_v6 = vpack.c.bf16 %v1139_v41, %v1137_v40  ;;  %v1169_v41 = vld [vmem:[#allocation4 + $0x520] sm:$0xff] }
 0x2f1   : > { %2818 = vmatpush1.bf16.msra.mxu0 %v2817_v49  ;;  %v1146_v49 = vld [vmem:[#allocation4 + $0x468] sm:$0xff] }
 0x2f2   : > { %2820 = vmatprep.subr.bf16.mxu0 %v2819_v52  ;;  %v1148_v52 = vld [vmem:[#allocation4 + $0x478] sm:$0xff] }
 0x2f3   : > { %v2843_v56 = vpack.c.bf16 %v1148_v52, %v1146_v49  ;;  %v1177_v49 = vld [vmem:[#allocation4 + $0x560] sm:$0xff]  ;;  %v1179_v52 = vld [vmem:[#allocation4 + $0x570] sm:$0xff] }
 0x2f5   : > { %2822 = vmatpush1.bf16.msra.mxu0 %v2821_v58  ;;  %v1150_v58 = vld [vmem:[#allocation4 + $0x488] sm:$0xff] }
 0x2f6   : > { %2824 = vmatprep.subr.bf16.mxu0 %v2823_v51  ;;  %v1152_v51 = vld [vmem:[#allocation4 + $0x498] sm:$0xff] }
 0x2f7   : > { %v2847_v61 = vpack.c.bf16 %v1152_v51, %v1150_v58  ;;  %v1183_v58 = vld [vmem:[#allocation4 + $0x590] sm:$0xff]  ;;  %v1186_v51 = vld [vmem:[#allocation4 + $0x5a8] sm:$0xff] }
 0x2f9   : > { %2826 = vmatpush1.bf16.msra.mxu0 %v2825_v48  ;;  %v1154_v48 = vld [vmem:[#allocation4 + $0x4a8] sm:$0xff] }
 0x2fa   : > { %2828 = vmatprep.subr.bf16.mxu0 %v2827_v0  ;;  %v1156_v0 = vld [vmem:[#allocation4 + $0x4b8] sm:$0xff] }
 0x2fb   : > { %v2851_v28 = vpack.c.bf16 %v1156_v0, %v1154_v48  ;;  %v1187_v48 = vld [vmem:[#allocation4 + $0x5b0] sm:$0xff]  ;;  %v1190_v0 = vld [vmem:[#allocation4 + $0x5c8] sm:$0xff] }
 0x2fd   : > { %2830 = vmatpush1.bf16.msra.mxu0 %v2829_v12  ;;  %v1160_v12 = vld [vmem:[#allocation4 + $0x4d8] sm:$0xff] }
 0x2fe   : > { %2832 = vmatprep.subr.bf16.mxu0 %v2831_v14  ;;  %v2853_v14 = vpack.c.bf16 %v1155_v16, %v1153_v11  ;;  %v1189_v16 = vld [vmem:[#allocation4 + $0x5c0] sm:$0xff] }
 0x336   : > { %v3205_v22 = vpop.permute.xlu1 %3204 }
 0x337   : > { %v3207_v21 = vunpack.i.h.bf16 %v3205_v22  ;;  %v3206_v29 = vunpack.i.l.bf16 %v3205_v22  ;;  %v2855_v22 = vpack.c.bf16 %v1160_v12, %v1158_v7  ;;  %v1191_v7 = vld [vmem:[#allocation4 + $0x5d0] sm:$0xff]  ;;  %v1194_v12 = vld [vmem:[#allocation4 + $0x5e8] sm:$0xff] }
 0x339   : > { %v971_v2 = vsel %vm413_vm1, %v3206_v29, %v3211_v47  ;;  %v967_v25 = vsel %vm413_vm1, %v3197_v32, %v3207_v21  ;;  %v1159_v29 = vld [vmem:[#allocation4 + $0x4d0] sm:$0xff] }
 0x33a   : > { %v3877_v26 = vpop.permute.xlu0 %3219  ;;  %v3879_v19 = vpop.permute.xlu1 %945  ;;  %v998_v23 = vmax.f32 %v3822_v10, %v971_v2  ;;  %v993_v31 = vmax.f32 %v3744_v13, %v967_v25  ;;  %v1142_v13 = vld [vmem:[#allocation4 + $0x448] sm:$0xff]  ;;  %v1161_v25 = vld [vmem:[#allocation4 + $0x4e0] sm:$0xff] }
 0x33b   : > { %v3222_v35 = vunpack.i.h.bf16 %v3877_v26  ;;  %v3221_v1 = vunpack.i.l.bf16 %v3877_v26  ;;  %v968_v15 = vsel %vm413_vm1, %v3207_v21, %v3879_v19  ;;  %v2839_v18 = vpack.c.bf16 %v1144_v45, %v1142_v13  ;;  %v1157_v21 = vld [vmem:[#allocation4 + $0x4c0] sm:$0xff]  ;;  %v1162_v2 = vld [vmem:[#allocation4 + $0x4e8] sm:$0xff] }
 0x33c   : > { %v994_v47 = vmax.f32 %v3818_v5, %v968_v15  ;;  %1292 = vmatmul.mubr.f32.gmra.mrb[6].mxu0 %v998_v23  ;;  %v1164_v23 = vld [vmem:[#allocation4 + $0x4f8] sm:$0xff]  ;;  %v2857_v34 = vpack.c.bf16 %v1159_v29, %v1157_v21  ;;  %v1166_v15 = vld [vmem:[#allocation4 + $0x508] sm:$0xff]  ;;  %v1193_v29 = vld [vmem:[#allocation4 + $0x5e0] sm:$0xff] }
 0x33d   : > { %v974_v10 = vsel %vm413_vm1, %v3221_v1, %v3222_v35  ;;  %v973_v44 = vsel %vm413_vm1, %v3212_v46, %v3221_v1  ;;  %v2859_v63 = vpack.c.bf16 %v1164_v23, %v1162_v2  ;;  %v1163_v1 = vld [vmem:[#allocation4 + $0x4f0] sm:$0xff]  ;;  %v1198_v23 = vld [vmem:[#allocation4 + $0x608] sm:$0xff] }
 0x33e   : > { %v882_v32 = vpop.permute.xlu1 %881  ;;  %1362 = vmatprep.mubr.f32.mxu0 %v994_v47  ;;  %v1001_v39 = vmax.f32 %v3838_v30, %v974_v10  ;;  %v1000_v46 = vmax.f32 %v3768_v62, %v973_v44  ;;  %v1147_v62 = vld [vmem:[#allocation4 + $0x470] sm:$0xff]  ;;  %v1168_v47 = vld [vmem:[#allocation4 + $0x518] sm:$0xff]  ;;  %v2861_v36 = vpack.c.bf16 %v1163_v1, %v1161_v25  ;;  %v1197_v1 = vld [vmem:[#allocation4 + $0x600] sm:$0xff] }
 0x33f   : > { %v894_v5 = vsel %vm395_vm2, %v3217_v53, %v882_v32  ;;  %v3900_v20 = vmax.f32 %v840_v24, %v882_v32  ;;  %v3911_v53 = vpop.permute.xlu0 %949  ;;  %v2845_v17 = vpack.c.bf16 %v1147_v62, %v1145_v57  ;;  %v2863_v37 = vpack.c.bf16 %v1168_v47, %v1166_v15  ;;  %v1167_v10 = vld [vmem:[#allocation4 + $0x510] sm:$0xff]  ;;  %v1172_v32 = vld [vmem:[#allocation4 + $0x538] sm:$0xff]  ;;  %v1181_v62 = vld [vmem:[#allocation4 + $0x580] sm:$0xff] }
 0x340   : > { %v3907_v30 = vmax.f32 %v839_v27, %v894_v5  ;;  %1363 = vmatmul.mubr.f32.vlgmr.msra.gmra.mrb[4].mxu0 %v993_v31  ;;  %v1143_v27 = vld [vmem:[#allocation4 + $0x450] sm:$0xff]  ;;  %v1170_v31 = vld [vmem:[#allocation4 + $0x528] sm:$0xff]  ;;  %v1176_v44 = vld [vmem:[#allocation4 + $0x558] sm:$0xff] }
 0x341   : > { %2834 = vmatpush1.bf16.msra.mxu0 %v2833_v38  ;;  %963 = vrot.lane.b32.xlu0 %v3900_v20, %s3357_s18  ;;  %v2841_v55 = vpack.c.bf16 %v1143_v27, %v1141_v8  ;;  %v1165_v38 = vld [vmem:[#allocation4 + $0x500] sm:$0xff]  ;;  %v2867_v40 = vpack.c.bf16 %v1172_v32, %v1170_v31  ;;  %v1171_v5 = vld [vmem:[#allocation4 + $0x530] sm:$0xff]  ;;  %v1180_v8 = vld [vmem:[#allocation4 + $0x578] sm:$0xff] }
 0x342   : > { %1368 = vmatprep.mubr.f32.mxu0 %v1001_v39  ;;  %961 = vrot.lane.b32.xlu1 %v3907_v30, %s3357_s18  ;;  %v3915_v42 = vpop.permute.xlu1 %947  ;;  %v2865_v39 = vpack.c.bf16 %v1167_v10, %v1165_v38  ;;  %v2869_v13 = vpack.c.bf16 %v1171_v5, %v1169_v41  ;;  %v1195_v2 = vld [vmem:[#allocation4 + $0x5f0] sm:$0xff]  ;;  %v1201_v32 = vld [vmem:[#allocation4 + $0x620] sm:$0xff]  ;;  %v1206_v41 = vld [vmem:[#allocation4 + $0x648] sm:$0x7f]  ;;  %s3368_s18 = smov 112  }
 0x343   : > { %v970_v24 = vsel %vm413_vm1, %v3915_v42, %v3911_v53  ;;  %2836 = vmatprep.subr.bf16.mxu0 %v2835_v43  ;;  %v1174_v43 = vld [vmem:[#allocation4 + $0x548] sm:$0xff]  ;;  %v1199_v15 = vld [vmem:[#allocation4 + $0x610] sm:$0xff]  ;;  %v969_v47 = vsel %vm413_vm1, %v3879_v19, %v3915_v42  ;;  %v1205_v5 = vld [vmem:[#allocation4 + $0x640] sm:$0x7f] }
 0x344   : > { %v996_v54 = vmax.f32 %v3870_v9, %v970_v24  ;;  %1369 = vmatmul.mubr.f32.gmra.mrb[6].mxu0 %v1000_v46  ;;  %v2849_v9 = vpack.c.bf16 %v1151_v4, %v1149_v60  ;;  %v2871_v45 = vpack.c.bf16 %v1176_v44, %v1174_v43  ;;  %v1175_v46 = vld [vmem:[#allocation4 + $0x550] sm:$0xff]  ;;  %v1185_v4 = vld [vmem:[#allocation4 + $0x5a0] sm:$0xff]  ;;  %v2897_v38 = vpack.c.bf16 %v1199_v15, %v1197_v1 }
 0x345   : > { %2838 = vmatpush1.bf16.msra.mxu0 %v2837_v6  ;;  %v1173_v6 = vld [vmem:[#allocation4 + $0x540] sm:$0xff]  ;;  %v995_v10 = vmax.f32 %v3852_v33, %v969_v47 }
 0x346   : > { %1439 = vmatprep.mubr.f32.mxu0 %v996_v54  ;;  %2840 = vmatprep.subr.bf16.mxu0 %v2839_v18  ;;  %v1178_v18 = vld [vmem:[#allocation4 + $0x568] sm:$0xff]  ;;  %v2873_v27 = vpack.c.bf16 %v1175_v46, %v1173_v6 }
 0x347   : > { %v2875_v24 = vpack.c.bf16 %v1180_v8, %v1178_v18  ;;  %v1182_v54 = vld [vmem:[#allocation4 + $0x588] sm:$0xff]  ;;  %v1687_v18 = vld [vmem:[%s4401_s4 + $0x8] sm:$0xff]  ;;  %v1730_v8 = vld [vmem:[%s4402_s5] sm:$0xff] }
 0x348   : > { %2586 = vmatprep.mubr.msk.f32.mxu1 %vm1754_vm0, %v1687_v18 }
 0x349   : > { %2842 = vmatpush1.bf16.msra.mxu0 %v2841_v55  ;;  %v1184_v55 = vld [vmem:[#allocation4 + $0x598] sm:$0xff] }
 0x34a   : > { %2844 = vmatprep.subr.bf16.mxu0 %v2843_v56  ;;  %v2877_v56 = vpack.c.bf16 %v1179_v52, %v1177_v49  ;;  %v2879_v57 = vpack.c.bf16 %v1184_v55, %v1182_v54  ;;  %v1733_v49 = vld [vmem:[%s4402_s5 + $0x18] sm:$0xff] }
 0x34d   : > { %2846 = vmatpush1.bf16.msra.mxu0 %v2845_v17  ;;  %v1188_v17 = vld [vmem:[#allocation4 + $0x5b8] sm:$0xff] }
 0x34e   : > { %2848 = vmatprep.subr.bf16.mxu0 %v2847_v61  ;;  %v2881_v61 = vpack.c.bf16 %v1183_v58, %v1181_v62  ;;  %v2883_v60 = vpack.c.bf16 %v1188_v17, %v1186_v51 }
 0x351   : > { %2850 = vmatpush1.bf16.msra.mxu0 %v2849_v9  ;;  %v1192_v9 = vld [vmem:[#allocation4 + $0x5d8] sm:$0xff] }
 0x352   : > { %2852 = vmatprep.subr.bf16.mxu0 %v2851_v28  ;;  %v2885_v28 = vpack.c.bf16 %v1187_v48, %v1185_v4  ;;  %v2887_v11 = vpack.c.bf16 %v1192_v9, %v1190_v0 }
 0x355   : > { %2854 = vmatpush1.bf16.msra.mxu0 %v2853_v14  ;;  %v1196_v14 = vld [vmem:[#allocation4 + $0x5f8] sm:$0xff] }
 0x356   : > { %2856 = vmatprep.subr.bf16.mxu0 %v2855_v22  ;;  %v2889_v22 = vpack.c.bf16 %v1191_v7, %v1189_v16  ;;  %v2891_v21 = vpack.c.bf16 %v1196_v14, %v1194_v12 }
 0x359   : > { %2858 = vmatpush1.bf16.msra.mxu0 %v2857_v34  ;;  %v1200_v34 = vld [vmem:[#allocation4 + $0x618] sm:$0xff] }
 0x35a   : > { %2860 = vmatprep.subr.bf16.mxu0 %v2859_v63  ;;  %v2893_v63 = vpack.c.bf16 %v1195_v2, %v1193_v29  ;;  %v2895_v25 = vpack.c.bf16 %v1200_v34, %v1198_v23 }
 0x35d   : > { %2862 = vmatpush1.bf16.msra.mxu0 %v2861_v36  ;;  %v1202_v36 = vld [vmem:[#allocation4 + $0x628] sm:$0xff] }
 0x35e   : > { %2864 = vmatprep.subr.bf16.mxu0 %v2863_v37  ;;  %v1204_v37 = vld [vmem:[#allocation4 + $0x638] sm:$0xff] }
 0x35f   : > { %v2899_v31 = vpack.c.bf16 %v1204_v37, %v1202_v36 }
 0x361   : > { %2866 = vmatpush1.bf16.msra.mxu0 %v2865_v39  ;;  %v1203_v39 = vld [vmem:[#allocation4 + $0x630] sm:$0xff] }
 0x362   : > { %2868 = vmatprep.subr.bf16.mxu0 %v2867_v40  ;;  %v2901_v40 = vpack.c.bf16 %v1203_v39, %v1201_v32 }
 0x365   : > { %2870 = vmatpush1.bf16.msra.mxu0 %v2869_v13 }
 0x366   : > { %2872 = vmatprep.subr.bf16.mxu0 %v2871_v45  ;;  %v997_v45 = vmax.f32 %v3860_v50, %v3911_v53 }
 0x369   : > { %2874 = vmatpush1.bf16.msra.mxu0 %v2873_v27  ;;  %v1731_v27 = vld [vmem:[%s4402_s5 + $0x8] sm:$0xff] }
 0x36a   : > { %2876 = vmatprep.subr.bf16.mxu0 %v2875_v24  ;;  %v1732_v24 = vld [vmem:[%s4402_s5 + $0x10] sm:$0xff] }
 0x36d   : > { %2878 = vmatpush1.bf16.msra.mxu0 %v2877_v56 }
 0x36e   : > { %2880 = vmatprep.subr.bf16.mxu0 %v2879_v57 }
 0x371   : > { %2882 = vmatpush1.bf16.msra.mxu0 %v2881_v61 }
 0x372   : > { %2884 = vmatprep.subr.bf16.mxu0 %v2883_v60 }
 0x375   : > { %2886 = vmatpush1.bf16.msra.mxu0 %v2885_v28 }
 0x376   : > { %2888 = vmatprep.subr.bf16.mxu0 %v2887_v11 }
 0x379   : > { %2890 = vmatpush1.bf16.msra.mxu0 %v2889_v22 }
 0x37a   : > { %2892 = vmatprep.subr.bf16.mxu0 %v2891_v21 }
 0x37d   : > { %2894 = vmatpush1.bf16.msra.mxu0 %v2893_v63 }
 0x37e   : > { %2896 = vmatprep.subr.bf16.mxu0 %v2895_v25 }
 0x380   : > { %1440 = vmatmul.mubr.f32.vlgmr.msra.gmra.mrb[4].mxu0 %v995_v10 }
 0x381   : > { %2898 = vmatpush1.bf16.msra.mxu0 %v2897_v38 }
 0x382   : > { %2900 = vmatprep.subr.bf16.mxu0 %v2899_v31 }
 0x385   : > { %2902 = vmatpush1.bf16.msra.mxu0 %v2901_v40 }
 0x386   : > { %2582 = vmatprep.subr.msk.mxu0 %vm1214_vm13, %v1206_v41 }
 0x389   : > { %2583 = vmatpush1.msk.msra.mxu0 %vm1214_vm13, %v1205_v5 }
 0x3b3   : > { %v964_v19 = vpop.permute.xlu0 %963 }
 0x3b4   : > { %v962_v42 = vpop.permute.xlu1 %961  ;;  %v1004_v26 = vmax.f32 %v3900_v20, %v964_v19 }
 0x3b5   : > { %v975_v33 = vsel %vm413_vm1, %v3222_v35, %v962_v42  ;;  %v976_v43 = vsel %vm413_vm1, %v962_v42, %v964_v19  ;;  %vm1582_vm1 = vcmask 916480  }
 0x3b6   : > { %v1002_v44 = vmax.f32 %v3842_v59, %v975_v33  ;;  %v1003_v13 = vmax.f32 %v3907_v30, %v976_v43 }
 0x3b8   : > { %1445 = vmatprep.mubr.f32.mxu0 %v1003_v13 }
 0x3b9   : > { %1446 = vmatmul.mubr.f32.gmra.mrb[6].mxu0 %v1002_v44 }
 0x3ba   : > { %1516 = vmatprep.mubr.f32.mxu0 %v3365_v3 }
 0x3bd   : > { %2584 = vmatmul.mubr.msk.f32.vlgmr.msra.gmra.mrb[4].mxu0 %vm1207_vm14, %v997_v45 }
 0x3be   : > { %1522 = vmatprep.mubr.f32.mxu0 %v3365_v3 }
 0x3c1   : > { %2585 = vmatmul.mubr.msk.f32.gmra.mrb[6].mxu0 %vm1207_vm14, %v1004_v26 }
 0x490   : > { %v1518_v35 = vpop.f32.mrb[4].mxu0 }
 0x491   : > { %1538 = vrot.lane.b32.xlu1 %v1518_v35, %s3358_s20  ;;  %v1520_v59 = vpop.f32.mrb[5].mxu0 }
 0x492   : > { %1531 = vst.msk [vmem:[#allocation3 + $0x8] sm:$0xff] %vm1530_vm15, %v1520_v59  ;;  %1540 = vrot.lane.b32.xlu0 %v1520_v59, %s3358_s20 }
 0x494   : > { %v1524_v30 = vpop.f32.mrb[6].mxu0 }
 0x495   : > { %1556 = vrot.lane.b32.xlu1 %v1518_v35, %s3360_s26  ;;  %v1526_v6 = vpop.f32.mrb[7].mxu0  ;;  %v2905_v50 = vpack.c.bf16 %v1524_v30, %v1518_v35 }
 0x496   : > { %1533 = vst.msk [vmem:[#allocation3 + $0x18] sm:$0xff] %vm1530_vm15, %v1526_v6  ;;  %1558 = vrot.lane.b32.xlu0 %v1520_v59, %s3360_s26 }
 0x499   : > { %1574 = vrot.lane.b32.xlu1 %v1518_v35, %s3368_s18  ;;  %v1695_v20 = vld [vmem:[#allocation3 + $0x8] sm:$0xff] }
 0x49a   : > { %1576 = vrot.lane.b32.xlu0 %v1520_v59, %s3368_s18 }
 0x49d   : > { %1593 = vrot.lane.b32.xlu1 %v1518_v35, %s3369_s29  ;;  %v1697_v53 = vld [vmem:[#allocation3 + $0x18] sm:$0xff] }
 0x49e   : > { %1595 = vrot.lane.b32.xlu0 %v1520_v59, %s3369_s29  ;;  %v2903_v46 = vpack.c.bf16 %v1697_v53, %v1695_v20 }
 0x4a0   : > { %2904 = vmatprep.subr.bf16.mxu1 %v2903_v46 }
 0x4a1   : > { %1612 = vrot.lane.b32.xlu1 %v1518_v35, %s3370_s15  ;;  %2906 = vmatpush1.bf16.msra.mxu1 %v2905_v50 }
 0x4a2   : > { %1614 = vrot.lane.b32.xlu0 %v1520_v59, %s3370_s15 }
 0x4a5   : > { %1631 = vrot.lane.b32.xlu1 %v1518_v35, %s3362_s27 }
 0x4a6   : > { %1633 = vrot.lane.b32.xlu0 %v1520_v59, %s3362_s27 }
 0x4a9   : > { %1649 = vrot.lane.b32.xlu1 %v1518_v35, %s3371_s19 }
 0x4aa   : > { %1651 = vrot.lane.b32.xlu0 %v1520_v59, %s3371_s19 }
 0x4ad   : > { %1668 = vrot.lane.b32.xlu1 %v1518_v35, %s3372_s24 }
 0x4ae   : > { %1670 = vrot.lane.b32.xlu0 %v1520_v59, %s3372_s24 }
 0x4b1   : > { %1542 = vrot.lane.b32.xlu1 %v1524_v30, %s3358_s20 }
 0x4b2   : > { %1544 = vrot.lane.b32.xlu0 %v1526_v6, %s3358_s20 }
 0x4b5   : > { %1560 = vrot.lane.b32.xlu1 %v1524_v30, %s3360_s26 }
 0x4b6   : > { %1562 = vrot.lane.b32.xlu0 %v1526_v6, %s3360_s26 }
 0x4b9   : > { %1578 = vrot.lane.b32.xlu1 %v1524_v30, %s3368_s18 }
 0x4ba   : > { %1580 = vrot.lane.b32.xlu0 %v1526_v6, %s3368_s18 }
 0x4bd   : > { %1597 = vrot.lane.b32.xlu1 %v1524_v30, %s3369_s29 }
 0x4be   : > { %1599 = vrot.lane.b32.xlu0 %v1526_v6, %s3369_s29 }
 0x4c1   : > { %1616 = vrot.lane.b32.xlu1 %v1524_v30, %s3370_s15 }
 0x4c2   : > { %1618 = vrot.lane.b32.xlu0 %v1526_v6, %s3370_s15  ;;  %s378_s15 = sand.u32 1, %s3341_s14  }
 0x4c3   : > { %s2469_s25 = scalar_lea.sflag [#allocation6], %s378_s15 }
 0x4c5   : > { %1635 = vrot.lane.b32.xlu1 %v1524_v30, %s3362_s27 }
 0x4c6   : > { %1637 = vrot.lane.b32.xlu0 %v1526_v6, %s3362_s27 }
 0x4c9   : > { %1653 = vrot.lane.b32.xlu1 %v1524_v30, %s3371_s19 }
 0x4ca   : > { %1655 = vrot.lane.b32.xlu0 %v1526_v6, %s3371_s19  ;;  %s2602_s19 = sshll.u32 %s3452_s17, 4  ;;  %s3375_s17 = smov [#allocation9]  }
 0x4cb   : > { %s4355_s30 = scalar_lea.hbm %s4407_s10, %s2602_s19  ;;  %s3283_s27 = sshll.u32 %s3375_s17, 4  ;;  %s3284_s27 = int_to_ptr.vmem [resolvable:$false] %s3283_s27 }
 0x4cc   : > { %s3285_s22 = scalar_lea.vmem %s3284_s27, 32 }
 0x4cd   : > { %1672 = vrot.lane.b32.xlu1 %v1524_v30, %s3372_s24 }
 0x4ce   : > { %1674 = vrot.lane.b32.xlu0 %v1526_v6, %s3372_s24  ;;  %s379_s24 = scalar_lea.vmem [#allocation9], %s378_s15 }
 0x4cf   : > { %s2481_s11 = sshll.u32 %s379_s24, 4  ;;  %s4357_s11 = int_to_ptr.vmem [resolvable:$true] %s2481_s11 }
 0x4d0   : > { %s3279_s12 = scalar_lea.vmem %s4357_s11, 16  ;;  %p3286_p4 = scmp.lt.s32.totalorder %s4357_s11, %s3284_s27 }
 0x4d1   : > { %1736 = vperm.xlu1 %3172, %v1730_v8   ;;  %p3280_p12 = scmp.ne.s32.totalorder %s4357_s11, %s3279_s12  ;;  %p3287_p7 = scmp.lt.s32.totalorder %s3285_s22, %s3279_s12 }
 0x4d2   : > { %1741 = vperm.xlu0 %3171, %v1731_v27  }
 0x4d3   : > { %p3281_p2 = pnand %p3280_p12, %p4434_p1  ;;  %p3288_p8 = por %p3287_p7, %p3286_p4 }
 0x4d5   : > { %1746 = vperm.xlu1 %3172, %v1732_v24   ;;  %p3282_p3 = pneg %p3281_p2 }
 0x4d6   : > { %1751 = vperm.xlu0 %3171, %v1733_v49  }
 0x4d7   : > { %p3289_p11 = pnand %p3288_p8, %p3282_p3 }
 0x503   : > { %v1539_v52 = vpop.permute.xlu1 %1538 }
 0x504   : > { %v1541_v54 = vpop.permute.xlu0 %1540 }
 0x505   : > { %v1546_v55 = vsel %vm395_vm2, %v1539_v52, %v1541_v54  ;;  %1553 = vst.msk [vmem:[#allocation3 + $0x28] sm:$0xff] %vm1530_vm15, %v1541_v54 }
 0x507   : > { %v1557_v56 = vpop.permute.xlu1 %1556 }
 0x508   : > { %v1559_v57 = vpop.permute.xlu0 %1558 }
 0x509   : > { %v1564_v62 = vsel %vm404_vm4, %v1557_v56, %v1559_v57  ;;  %1571 = vst.msk [vmem:[#allocation3 + $0x48] sm:$0xff] %vm1530_vm15, %v1559_v57 }
 0x50b   : > { %v1575_v58 = vpop.permute.xlu1 %1574 }
 0x50c   : > { %v1577_v51 = vpop.permute.xlu0 %1576  ;;  %v1699_v36 = vld [vmem:[#allocation3 + $0x28] sm:$0xff] }
 0x50d   : > { %v3976_v17 = vsel %vm1582_vm1, %v1575_v58, %v1577_v51  ;;  %1590 = vst.msk [vmem:[#allocation3 + $0x68] sm:$0xff] %vm1530_vm15, %v1577_v51 }
 0x50f   : > { %v1594_v61 = vpop.permute.xlu1 %1593 }
 0x510   : > { %v1596_v60 = vpop.permute.xlu0 %1595  ;;  %v1703_v40 = vld [vmem:[#allocation3 + $0x48] sm:$0xff] }
 0x511   : > { %v3980_v4 = vsel %vm1601_vm3, %v1594_v61, %v1596_v60  ;;  %1609 = vst.msk [vmem:[#allocation3 + $0x88] sm:$0xff] %vm1530_vm15, %v1596_v60 }
 0x513   : > { %v1613_v48 = vpop.permute.xlu1 %1612 }
 0x514   : > { %v1615_v0 = vpop.permute.xlu0 %1614  ;;  %v1707_v44 = vld [vmem:[#allocation3 + $0x68] sm:$0xff] }
 0x515   : > { %v3984_v9 = vsel %vm1620_vm5, %v1613_v48, %v1615_v0  ;;  %1628 = vst.msk [vmem:[#allocation3 + $0xa8] sm:$0xff] %vm1530_vm15, %v1615_v0 }
 0x517   : > { %v1632_v28 = vpop.permute.xlu1 %1631 }
 0x518   : > { %v1634_v11 = vpop.permute.xlu0 %1633  ;;  %v1711_v6 = vld [vmem:[#allocation3 + $0x88] sm:$0xff] }
 0x519   : > { %v3988_v16 = vsel %vm431_vm6, %v1632_v28, %v1634_v11  ;;  %1646 = vst.msk [vmem:[#allocation3 + $0xc8] sm:$0xff] %vm1530_vm15, %v1634_v11 }
 0x51b   : > { %v1650_v7 = vpop.permute.xlu1 %1649 }
 0x51c   : > { %v1652_v12 = vpop.permute.xlu0 %1651  ;;  %v1715_v27 = vld [vmem:[#allocation3 + $0xa8] sm:$0xff] }
 0x51d   : > { %v3992_v14 = vsel %vm1657_vm7, %v1650_v7, %v1652_v12  ;;  %1665 = vst.msk [vmem:[#allocation3 + $0xe8] sm:$0xff] %vm1530_vm15, %v1652_v12  ;;  %v1689_v7 = vld [vmem:[%s4401_s4 + $0x18] sm:$0xff]  ;;  %v1688_v12 = vld [vmem:[%s4401_s4 + $0x10] sm:$0xff] }
 0x51f   : > { %v1669_v22 = vpop.permute.xlu1 %1668 }
 0x520   : > { %v1671_v21 = vpop.permute.xlu0 %1670  ;;  %v1719_v57 = vld [vmem:[#allocation3 + $0xc8] sm:$0xff] }
 0x521   : > { %v3996_v29 = vsel %vm1530_vm15, %v1669_v22, %v1671_v21  ;;  %1683 = vst.msk [vmem:[#allocation3 + $0x108] sm:$0xff] %vm1530_vm15, %v1671_v21  ;;  %v1690_v22 = vld [vmem:[%s4401_s4 + $0x20] sm:$0xff]  ;;  %v1693_v21 = vld [vmem:[%s4401_s4 + $0x38] sm:$0xff] }
 0x523   : > { %v1543_v2 = vpop.permute.xlu1 %1542 }
 0x524   : > { %v1545_v23 = vpop.permute.xlu0 %1544  ;;  %v1723_v61 = vld [vmem:[#allocation3 + $0xe8] sm:$0xff] }
 0x525   : > { %v1547_v34 = vsel %vm395_vm2, %v1543_v2, %v1545_v23  ;;  %1555 = vst.msk [vmem:[#allocation3 + $0x38] sm:$0xff] %vm1530_vm15, %v1545_v23 }
 0x526   : > { %v2909_v31 = vpack.c.bf16 %v1547_v34, %v1546_v55 }
 0x527   : > { %v1561_v63 = vpop.permute.xlu1 %1560 }
 0x528   : > { %v1563_v25 = vpop.permute.xlu0 %1562  ;;  %v1727_v0 = vld [vmem:[#allocation3 + $0x108] sm:$0xff] }
 0x529   : > { %v1565_v1 = vsel %vm404_vm4, %v1561_v63, %v1563_v25  ;;  %1573 = vst.msk [vmem:[#allocation3 + $0x58] sm:$0xff] %vm1530_vm15, %v1563_v25  ;;  %vm2043_vm4 = vcmask 1044480  }
 0x52a   : > { %v2913_v42 = vpack.c.bf16 %v1565_v1, %v1564_v62 }
 0x52b   : > { %v1579_v15 = vpop.permute.xlu1 %1578 }
 0x52c   : > { %v1581_v47 = vpop.permute.xlu0 %1580  ;;  %v1701_v37 = vld [vmem:[#allocation3 + $0x38] sm:$0xff] }
 0x52d   : > { %v1584_v38 = vsel %vm1582_vm1, %v1579_v15, %v1581_v47  ;;  %1592 = vst.msk [vmem:[#allocation3 + $0x78] sm:$0xff] %vm1530_vm15, %v1581_v47  ;;  %v2907_v10 = vpack.c.bf16 %v1701_v37, %v1699_v36 }
 0x52e   : > { %v2917_v35 = vpack.c.bf16 %v1584_v38, %v3976_v17 }
 0x52f   : > { %v1598_v32 = vpop.permute.xlu1 %1597  ;;  %2908 = vmatprep.subr.bf16.mxu1 %v2907_v10 }
 0x530   : > { %v1600_v39 = vpop.permute.xlu0 %1599  ;;  %2910 = vmatpush1.bf16.msra.mxu1 %v2909_v31  ;;  %v1705_v41 = vld [vmem:[#allocation3 + $0x58] sm:$0xff] }
 0x531   : > { %v1603_v5 = vsel %vm1601_vm3, %v1598_v32, %v1600_v39  ;;  %1611 = vst.msk [vmem:[#allocation3 + $0x98] sm:$0xff] %vm1530_vm15, %v1600_v39  ;;  %v2911_v19 = vpack.c.bf16 %v1705_v41, %v1703_v40  ;;  %v1953_v41 = vld [vmem:[#allocation7 + $0x8] sm:$0xff] }
 0x532   : > { %v2921_v46 = vpack.c.bf16 %v1603_v5, %v3980_v4  ;;  %v1956_v5 = vld [vmem:[#allocation7 + $0x20] sm:$0xff] }
 0x533   : > { %v1617_v33 = vpop.permute.xlu1 %1616  ;;  %2912 = vmatprep.subr.bf16.mxu1 %v2911_v19  ;;  %v1952_v19 = vld [vmem:[#allocation7] sm:$0xff] }
 0x534   : > { %v1619_v43 = vpop.permute.xlu0 %1618  ;;  %2914 = vmatpush1.bf16.msra.mxu1 %v2913_v42  ;;  %v1709_v13 = vld [vmem:[#allocation3 + $0x78] sm:$0xff] }
 0x535   : > { %v1622_v45 = vsel %vm1620_vm5, %v1617_v33, %v1619_v43  ;;  %1630 = vst.msk [vmem:[#allocation3 + $0xb8] sm:$0xff] %vm1530_vm15, %v1619_v43  ;;  %v2915_v26 = vpack.c.bf16 %v1709_v13, %v1707_v44  ;;  %v2939_v43 = vpack.c.bf16 %v1956_v5, %v1953_v41  ;;  %v1955_v44 = vld [vmem:[#allocation7 + $0x18] sm:$0xff] }
 0x536   : > { %v2925_v54 = vpack.c.bf16 %v1622_v45, %v3984_v9  ;;  %v1959_v13 = vld [vmem:[#allocation7 + $0x38] sm:$0xff]  ;;  %v1962_v45 = vld [vmem:[#allocation7 + $0x50] sm:$0xff] }
 0x537   : > { %v1636_v59 = vpop.permute.xlu1 %1635  ;;  %2916 = vmatprep.subr.bf16.mxu1 %v2915_v26 }
 0x538   : > { %v1638_v30 = vpop.permute.xlu0 %1637  ;;  %2918 = vmatpush1.bf16.msra.mxu1 %v2917_v35  ;;  %v1713_v50 = vld [vmem:[#allocation3 + $0x98] sm:$0xff]  ;;  %v2941_v35 = vpack.c.bf16 %v1955_v44, %v1952_v19  ;;  %v1994_v19 = vld [vmem:[#allocation7 + $0x150] sm:$0xff]  ;;  %v2004_v44 = vld [vmem:[#allocation7 + $0x1a0] sm:$0xff] }
 0x539   : > { %v1640_v20 = vsel %vm431_vm6, %v1636_v59, %v1638_v30  ;;  %1648 = vst.msk [vmem:[#allocation3 + $0xd8] sm:$0xff] %vm1530_vm15, %v1638_v30  ;;  %v2919_v53 = vpack.c.bf16 %v1713_v50, %v1711_v6  ;;  %v2943_v59 = vpack.c.bf16 %v1962_v45, %v1959_v13  ;;  %v1958_v30 = vld [vmem:[#allocation7 + $0x30] sm:$0xff]  ;;  %v1961_v6 = vld [vmem:[#allocation7 + $0x48] sm:$0xff]  ;;  %vm4094_vm6 = vmpackc.low %vm2043_vm4, %vm3367_vm10 }
 0x53a   : > { %v2929_v17 = vpack.c.bf16 %v1640_v20, %v3988_v16  ;;  %v1686_v16 = vld [vmem:[%s4401_s4] sm:$0xff]  ;;  %v1965_v50 = vld [vmem:[#allocation7 + $0x68] sm:$0xff] }
 0x53b   : > { %v1654_v18 = vpop.permute.xlu1 %1653  ;;  %2920 = vmatprep.subr.bf16.mxu1 %v2919_v53  ;;  %v1968_v53 = vld [vmem:[#allocation7 + $0x80] sm:$0xff] }
 0x53c   : > { %v1656_v8 = vpop.permute.xlu0 %1655  ;;  %2922 = vmatpush1.bf16.msra.mxu1 %v2921_v46  ;;  %v1717_v24 = vld [vmem:[#allocation3 + $0xb8] sm:$0xff] }
 0x53d   : > { %v1659_v49 = vsel %vm1657_vm7, %v1654_v18, %v1656_v8  ;;  %1667 = vst.msk [vmem:[#allocation3 + $0xf8] sm:$0xff] %vm1530_vm15, %v1656_v8  ;;  %v2923_v52 = vpack.c.bf16 %v1717_v24, %v1715_v27  ;;  %v2945_v27 = vpack.c.bf16 %v1961_v6, %v1958_v30  ;;  %v2007_v30 = vld [vmem:[#allocation7 + $0x1b8] sm:$0xff]  ;;  %v2010_v6 = vld [vmem:[#allocation7 + $0x1d0] sm:$0xff] }
 0x53e   : > { %v2933_v48 = vpack.c.bf16 %v1659_v49, %v3992_v14  ;;  %v1691_v14 = vld [vmem:[%s4401_s4 + $0x28] sm:$0xff] }
 0x53f   : > { %v1673_v55 = vpop.permute.xlu1 %1672  ;;  %2924 = vmatprep.subr.bf16.mxu1 %v2923_v52  ;;  %v2947_v52 = vpack.c.bf16 %v1968_v53, %v1965_v50  ;;  %v2975_v53 = vpack.c.bf16 %v2010_v6, %v2007_v30  ;;  %v1966_v30 = vld [vmem:[#allocation7 + $0x70] sm:$0xff]  ;;  %v1969_v6 = vld [vmem:[#allocation7 + $0x88] sm:$0xff] }
 0x540   : > { %v1675_v56 = vpop.permute.xlu0 %1674  ;;  %2926 = vmatpush1.bf16.msra.mxu1 %v2925_v54  ;;  %v1721_v62 = vld [vmem:[#allocation3 + $0xd8] sm:$0xff]  ;;  %v1964_v54 = vld [vmem:[#allocation7 + $0x60] sm:$0xff] }
 0x541   : > { %v1677_v58 = vsel %vm1530_vm15, %v1673_v55, %v1675_v56  ;;  %1685 = vst.msk [vmem:[#allocation3 + $0x118] sm:$0xff] %vm1530_vm15, %v1675_v56  ;;  %v2927_v51 = vpack.c.bf16 %v1721_v62, %v1719_v57  ;;  %v1967_v55 = vld [vmem:[#allocation7 + $0x78] sm:$0xff]  ;;  %v1974_v62 = vld [vmem:[#allocation7 + $0xb0] sm:$0xff] }
 0x542   : > { %v2937_v11 = vpack.c.bf16 %v1677_v58, %v3996_v29  ;;  %v1692_v29 = vld [vmem:[%s4401_s4 + $0x30] sm:$0xff]  ;;  %v1971_v57 = vld [vmem:[#allocation7 + $0x98] sm:$0xff] }
 0x543   : > { %2928 = vmatprep.subr.bf16.mxu1 %v2927_v51 }
 0x544   : > { %2930 = vmatpush1.bf16.msra.mxu1 %v2929_v17  ;;  %v1725_v60 = vld [vmem:[#allocation3 + $0xf8] sm:$0xff]  ;;  %v2949_v17 = vpack.c.bf16 %v1967_v55, %v1964_v54  ;;  %v2012_v55 = vld [vmem:[#allocation7 + $0x1e0] sm:$0xff] }
 0x545   : > { %v2931_v4 = vpack.c.bf16 %v1725_v60, %v1723_v61  ;;  %v2951_v61 = vpack.c.bf16 %v1974_v62, %v1971_v57  ;;  %v1970_v60 = vld [vmem:[#allocation7 + $0x90] sm:$0xff]  ;;  %v2015_v57 = vld [vmem:[#allocation7 + $0x1f8] sm:$0xff] }
 0x546   : > { %v2019_v62 = vld [vmem:[#allocation7 + $0x218] sm:$0xff] }
 0x547   : > { %2932 = vmatprep.subr.bf16.mxu1 %v2931_v4  ;;  %v1973_v4 = vld [vmem:[#allocation7 + $0xa8] sm:$0xff] }
 0x548   : > { %2934 = vmatpush1.bf16.msra.mxu1 %v2933_v48  ;;  %v1729_v9 = vld [vmem:[#allocation3 + $0x118] sm:$0xff] }
 0x549   : > { %v2935_v28 = vpack.c.bf16 %v1729_v9, %v1727_v0  ;;  %v1977_v48 = vld [vmem:[#allocation7 + $0xc8] sm:$0xff]  ;;  %v1980_v0 = vld [vmem:[#allocation7 + $0xe0] sm:$0xff]  ;;  %v2953_v9 = vpack.c.bf16 %v1973_v4, %v1970_v60  ;;  %v2018_v4 = vld [vmem:[#allocation7 + $0x210] sm:$0xff] }
 0x54b   : > { %2936 = vmatprep.subr.bf16.mxu1 %v2935_v28  ;;  %v2955_v28 = vpack.c.bf16 %v1980_v0, %v1977_v48  ;;  %v2021_v48 = vld [vmem:[#allocation7 + $0x228] sm:$0xff] }
 0x54c   : > { %2938 = vmatpush1.bf16.msra.mxu1 %v2937_v11  ;;  %v1976_v11 = vld [vmem:[#allocation7 + $0xc0] sm:$0xff]  ;;  %v2025_v0 = vld [vmem:[#allocation7 + $0x248] sm:$0xff] }
 0x54d   : > { %2940 = vmatprep.subr.bf16.mxu1 %v2939_v43  ;;  %v2001_v43 = vld [vmem:[#allocation7 + $0x188] sm:$0xff] }
 0x54e   : > { %v2971_v45 = vpack.c.bf16 %v2004_v44, %v2001_v43 }
 0x54f   : > { %1832 = vmatmul.mubr.f32.vlgmr.msra.gmra.mrb[10].mxu1 %v1686_v16  ;;  %v1979_v16 = vld [vmem:[#allocation7 + $0xd8] sm:$0xff] }
 0x550   : > { %2587 = vmatprep.mubr.msk.f32.mxu1 %vm1754_vm0, %v1689_v7  ;;  %v1737_v2 = vpop.permute.xlu1 %1736  ;;  %2942 = vmatpush1.bf16.msra.mxu1 %v2941_v35  ;;  %v1983_v7 = vld [vmem:[#allocation7 + $0xf8] sm:$0xff]  ;;  %v2000_v35 = vld [vmem:[#allocation7 + $0x180] sm:$0xff] }
 0x551   : > { %v1742_v15 = vpop.permute.xlu0 %1741  ;;  %2944 = vmatprep.subr.bf16.mxu1 %v2943_v59  ;;  %v2003_v59 = vld [vmem:[#allocation7 + $0x198] sm:$0xff] }
 0x552   : > { %v2973_v50 = vpack.c.bf16 %v2003_v59, %v2000_v35 }
 0x553   : > { %1838 = vmatmul.mubr.f32.gmra.mrb[12].mxu1 %v1688_v12  ;;  %v1986_v12 = vld [vmem:[#allocation7 + $0x110] sm:$0xff] }
 0x554   : > { %2588 = vmatprep.mubr.msk.f32.mxu1 %vm1754_vm0, %v1691_v14  ;;  %v1747_v32 = vpop.permute.xlu1 %1746  ;;  %2946 = vmatpush1.bf16.msra.mxu1 %v2945_v27  ;;  %v2957_v14 = vpack.c.bf16 %v1979_v16, %v1976_v11  ;;  %v2013_v27 = vld [vmem:[#allocation7 + $0x1e8] sm:$0xff]  ;;  %v2283_v16 = vld [vmem:[%s4405_s8] sm:$0xff] }
 0x555   : > { %v1752_v46 = vpop.permute.xlu0 %1751  ;;  %2948 = vmatprep.subr.bf16.mxu1 %v2947_v52 }
 0x557   : > { %1844 = vmatmul.mubr.f32.gmra.mrb[14].mxu1 %v1690_v22  ;;  %v2959_v22 = vpack.c.bf16 %v1986_v12, %v1983_v7  ;;  %v2024_v7 = vld [vmem:[#allocation7 + $0x240] sm:$0xff]  ;;  %v2027_v12 = vld [vmem:[#allocation7 + $0x258] sm:$0x1f] }
 0x558   : > { %2589 = vmatprep.mubr.msk.f32.mxu1 %vm1754_vm0, %v1693_v21  ;;  %2950 = vmatpush1.bf16.msra.mxu1 %v2949_v17  ;;  %v1982_v21 = vld [vmem:[#allocation7 + $0xf0] sm:$0xff] }
 0x559   : > { %2952 = vmatprep.subr.bf16.mxu1 %v2951_v61  ;;  %v2022_v17 = vld [vmem:[#allocation7 + $0x230] sm:$0xff]  ;;  %v2981_v61 = vpack.c.bf16 %v2015_v57, %v2012_v55 }
 0x55a   : > { %v2983_v60 = vpack.c.bf16 %v2022_v17, %v2019_v62 }
 0x55b   : > { %1850 = vmatmul.mubr.f32.gmra.mrb[16].mxu1 %v1692_v29  ;;  %v1985_v29 = vld [vmem:[#allocation7 + $0x108] sm:$0xff] }
 0x55c   : > { %2954 = vmatpush1.bf16.msra.mxu1 %v2953_v9  ;;  %v2028_v9 = vld [vmem:[#allocation7 + $0x260] sm:$0x1f] }
 0x55d   : > { %2956 = vmatprep.subr.bf16.mxu1 %v2955_v28  ;;  %v2985_v28 = vpack.c.bf16 %v2021_v48, %v2018_v4  ;;  %v2987_v11 = vpack.c.bf16 %v2028_v9, %v2025_v0  ;;  %v1978_v4 = vld [vmem:[#allocation7 + $0xd0] sm:$0xff]  ;;  %v1981_v48 = vld [vmem:[#allocation7 + $0xe8] sm:$0xff]  ;;  %v1984_v9 = vld [vmem:[#allocation7 + $0x100] sm:$0xff] }
 0x55e   : > { %v3006_v0 = vpack.c.bf16 %v1981_v48, %v1978_v4  ;;  %v2311_v48 = vld [vmem:[%s4405_s8 + $0xe0] sm:$0xff] }
 0x560   : > { %2958 = vmatpush1.bf16.msra.mxu1 %v2957_v14  ;;  %v2990_v14 = vpack.c.bf16 %v2027_v12, %v2024_v7  ;;  %v1990_v7 = vld [vmem:[#allocation7 + $0x130] sm:$0xff]  ;;  %v1993_v12 = vld [vmem:[#allocation7 + $0x148] sm:$0xff] }
 0x561   : > { %2960 = vmatprep.subr.bf16.mxu1 %v2959_v22  ;;  %v3373_v22 = vmov 0.0|0.0  }
 0x622   : > { %v1833_v23 = vpop.f32.mrb[10].mxu1 }
 0x623   : > { %v4045_v34 = vadd.f32 %v1833_v23, %v1737_v2  ;;  %v1835_v63 = vpop.f32.mrb[11].mxu1  ;;  %v1992_v23 = vld [vmem:[#allocation7 + $0x140] sm:$0xff] }
 0x624   : > { %v4047_v25 = vadd.f32 %v1835_v63, %v1737_v2  ;;  %v1989_v2 = vld [vmem:[#allocation7 + $0x128] sm:$0xff]  ;;  %v2961_v63 = vpack.c.bf16 %v1985_v29, %v1982_v21 }
 0x625   : > { %v1856_v1 = vmax.f32 %v4045_v34, 0.0 }
 0x626   : > { %v1857_v47 = vmax.f32 %v4047_v25, 0.0  ;;  %v1839_v36 = vpop.f32.mrb[12].mxu1  ;;  %2962 = vmatpush1.bf16.msra.mxu1 %v2961_v63 }
 0x627   : > { %v4051_v37 = vadd.f32 %v1839_v36, %v1742_v15  ;;  %v1841_v38 = vpop.f32.mrb[13].mxu1  ;;  %1872 = vrot.lane.b32.xlu1 %v1856_v1, %s3358_s20  ;;  %v1988_v36 = vld [vmem:[#allocation7 + $0x120] sm:$0xff] }
 0x628   : > { %v4056_v10 = vadd.f32 %v1841_v38, %v1742_v15  ;;  %1874 = vrot.lane.b32.xlu0 %v1857_v47, %s3358_s20  ;;  %v2963_v15 = vpack.c.bf16 %v1992_v23, %v1989_v2  ;;  %v1991_v38 = vld [vmem:[#allocation7 + $0x138] sm:$0xff] }
 0x629   : > { %v1858_v31 = vmax.f32 %v4051_v37, 0.0  ;;  %v2965_v41 = vpack.c.bf16 %v1991_v38, %v1988_v36 }
 0x62a   : > { %v1859_v39 = vmax.f32 %v4056_v10, 0.0  ;;  %v1845_v40 = vpop.f32.mrb[14].mxu1  ;;  %2964 = vmatprep.subr.bf16.mxu1 %v2963_v15 }
 0x62b   : > { %v4063_v42 = vadd.f32 %v1845_v40, %v1747_v32  ;;  %v1847_v33 = vpop.f32.mrb[15].mxu1  ;;  %1876 = vrot.lane.b32.xlu1 %v1858_v31, %s3358_s20  ;;  %v1998_v40 = vld [vmem:[#allocation7 + $0x170] sm:$0xff]  ;;  %2966 = vmatpush1.bf16.msra.mxu1 %v2965_v41 }
 0x62c   : > { %v4068_v26 = vadd.f32 %v1847_v33, %v1747_v32  ;;  %1878 = vrot.lane.b32.xlu0 %v1859_v39, %s3358_s20  ;;  %v1995_v32 = vld [vmem:[#allocation7 + $0x158] sm:$0xff]  ;;  %v1997_v33 = vld [vmem:[#allocation7 + $0x168] sm:$0xff] }
 0x62d   : > { %v1860_v20 = vmax.f32 %v4063_v42, 0.0  ;;  %v2967_v5 = vpack.c.bf16 %v1998_v40, %v1995_v32  ;;  %v2969_v13 = vpack.c.bf16 %v1997_v33, %v1994_v19  ;;  %v1954_v42 = vld [vmem:[#allocation7 + $0x10] sm:$0xff] }
 0x62e   : > { %v1861_v18 = vmax.f32 %v4068_v26, 0.0  ;;  %v1851_v8 = vpop.f32.mrb[16].mxu1  ;;  %v1957_v26 = vld [vmem:[#allocation7 + $0x28] sm:$0xff] }
 0x62f   : > { %v4075_v24 = vadd.f32 %v1851_v8, %v1752_v46  ;;  %v1853_v49 = vpop.f32.mrb[17].mxu1  ;;  %1880 = vrot.lane.b32.xlu1 %v1860_v20, %s3358_s20  ;;  %2968 = vmatprep.subr.bf16.mxu1 %v2967_v5  ;;  %v2009_v8 = vld [vmem:[#allocation7 + $0x1c8] sm:$0xff]  ;;  %v2994_v43 = vpack.c.bf16 %v1957_v26, %v1954_v42 }
 0x630   : > { %v4080_v56 = vadd.f32 %v1853_v49, %v1752_v46  ;;  %1882 = vrot.lane.b32.xlu0 %v1861_v18, %s3358_s20  ;;  %2970 = vmatpush1.bf16.msra.mxu1 %v2969_v13  ;;  %v2006_v46 = vld [vmem:[#allocation7 + $0x1b0] sm:$0xff]  ;;  %v2016_v49 = vld [vmem:[#allocation7 + $0x200] sm:$0xff]  ;;  %v2284_v26 = vld [vmem:[%s4405_s8 + $0x8] sm:$0xff] }
 0x631   : > { %v1862_v58 = vmax.f32 %v4075_v24, 0.0  ;;  %2972 = vmatprep.subr.bf16.mxu1 %v2971_v45  ;;  %v2977_v52 = vpack.c.bf16 %v2009_v8, %v2006_v46  ;;  %v2979_v54 = vpack.c.bf16 %v2016_v49, %v2013_v27  ;;  %v1963_v24 = vld [vmem:[#allocation7 + $0x58] sm:$0xff]  ;;  %v3000_v27 = vpack.c.bf16 %v1969_v6, %v1966_v30 }
 0x632   : > { %v1863_v51 = vmax.f32 %v4080_v56, 0.0  ;;  %v1960_v56 = vld [vmem:[#allocation7 + $0x40] sm:$0xff]  ;;  %v2306_v30 = vld [vmem:[%s4405_s8 + $0xb8] sm:$0xff] }
 0x633   : > { %1884 = vrot.lane.b32.xlu1 %v1862_v58, %s3358_s20  ;;  %v2997_v35 = vpack.c.bf16 %v1963_v24, %v1960_v56  ;;  %v2303_v24 = vld [vmem:[%s4405_s8 + $0xa0] sm:$0xff] }
 0x634   : > { %1886 = vrot.lane.b32.xlu0 %v1863_v51, %s3358_s20  ;;  %2974 = vmatpush1.bf16.msra.mxu1 %v2973_v50 }
 0x635   : > { %2976 = vmatprep.subr.bf16.mxu1 %v2975_v53 }
 0x638   : > { %2978 = vmatpush1.bf16.msra.mxu1 %v2977_v52  ;;  %v1972_v52 = vld [vmem:[#allocation7 + $0xa0] sm:$0xff] }
 0x639   : > { %2980 = vmatprep.subr.bf16.mxu1 %v2979_v54  ;;  %v1975_v54 = vld [vmem:[#allocation7 + $0xb8] sm:$0xff] }
 0x63c   : > { %2982 = vmatpush1.bf16.msra.mxu1 %v2981_v61  ;;  %v3003_v61 = vpack.c.bf16 %v1975_v54, %v1972_v52  ;;  %v2291_v52 = vld [vmem:[%s4405_s8 + $0x40] sm:$0xff]  ;;  %v2292_v54 = vld [vmem:[%s4405_s8 + $0x48] sm:$0xff] }
 0x63d   : > { %2984 = vmatprep.subr.bf16.mxu1 %v2983_v60 }
 0x640   : > { %2986 = vmatpush1.bf16.msra.mxu1 %v2985_v28  ;;  %v1987_v28 = vld [vmem:[#allocation7 + $0x118] sm:$0xff] }
 0x641   : > { %2989 = vmatprep.subr.msk.bf16.mxu1 %vm4094_vm6, %v2987_v11  ;;  %v3009_v11 = vpack.c.bf16 %v1987_v28, %v1984_v9  ;;  %v2295_v28 = vld [vmem:[%s4405_s8 + $0x60] sm:$0xff] }
 0x644   : > { %2992 = vmatpush1.bf16.msk.msra.mxu1 %vm4094_vm6, %v2990_v14  ;;  %v3012_v14 = vpack.c.bf16 %v1993_v12, %v1990_v7  ;;  %v2313_v12 = vld [vmem:[%s4405_s8 + $0xf0] sm:$0xff] }
 0x645   : > { %2993 = vmatprep.subr.bf16.mxu1 %v3373_v22 }
 0x699   : > { %v1873_v21 = vpop.permute.xlu1 %1872 }
 0x69a   : > { %v1875_v29 = vpop.permute.xlu0 %1874 }
 0x69b   : > { %v1888_v2 = vsel %vm395_vm2, %v1873_v21, %v1875_v29  ;;  %v1901_v23 = vmax.f32 %v1857_v47, %v1875_v29  ;;  %v1996_v21 = vld [vmem:[#allocation7 + $0x160] sm:$0xff]  ;;  %v1999_v29 = vld [vmem:[#allocation7 + $0x178] sm:$0xff] }
 0x69c   : > { %v1900_v63 = vmax.f32 %v1856_v1, %v1888_v2  ;;  %v3015_v2 = vpack.c.bf16 %v1999_v29, %v1996_v21  ;;  %v2297_v21 = vld [vmem:[%s4405_s8 + $0x70] sm:$0xff] }
 0x69d   : > { %1918 = vrot.lane.b32.xlu0 %v1901_v23, %s3368_s18  ;;  %v1877_v15 = vpop.permute.xlu1 %1876 }
 0x69e   : > { %v1879_v36 = vpop.permute.xlu0 %1878  ;;  %1916 = vrot.lane.b32.xlu1 %v1900_v63, %s3368_s18 }
 0x69f   : > { %v1889_v38 = vsel %vm395_vm2, %v1877_v15, %v1879_v36  ;;  %v1903_v32 = vmax.f32 %v1859_v39, %v1879_v36  ;;  %v2008_v36 = vld [vmem:[#allocation7 + $0x1c0] sm:$0xff] }
 0x6a0   : > { %v1902_v40 = vmax.f32 %v1858_v31, %v1889_v38  ;;  %v2011_v38 = vld [vmem:[#allocation7 + $0x1d8] sm:$0xff] }
 0x6a1   : > { %1922 = vrot.lane.b32.xlu0 %v1903_v32, %s3368_s18  ;;  %v1881_v25 = vpop.permute.xlu1 %1880 }
 0x6a2   : > { %v1883_v47 = vpop.permute.xlu0 %1882  ;;  %1920 = vrot.lane.b32.xlu1 %v1902_v40, %s3368_s18 }
 0x6a3   : > { %v1890_v34 = vsel %vm395_vm2, %v1881_v25, %v1883_v47  ;;  %v1905_v1 = vmax.f32 %v1861_v18, %v1883_v47  ;;  %v2017_v25 = vld [vmem:[#allocation7 + $0x208] sm:$0xff] }
 0x6a4   : > { %v1904_v41 = vmax.f32 %v1860_v20, %v1890_v34  ;;  %v2020_v34 = vld [vmem:[#allocation7 + $0x220] sm:$0xff] }
 0x6a5   : > { %1926 = vrot.lane.b32.xlu0 %v1905_v1, %s3368_s18  ;;  %v1885_v10 = vpop.permute.xlu1 %1884 }
 0x6a6   : > { %v1887_v39 = vpop.permute.xlu0 %1886  ;;  %1924 = vrot.lane.b32.xlu1 %v1904_v41, %s3368_s18 }
 0x6a7   : > { %v1891_v37 = vsel %vm395_vm2, %v1885_v10, %v1887_v39  ;;  %v1907_v31 = vmax.f32 %v1863_v51, %v1887_v39  ;;  %v2026_v10 = vld [vmem:[#allocation7 + $0x250] sm:$0xff]  ;;  %v2029_v39 = vld [vmem:[#allocation7 + $0x268] sm:$0x1f]  ;;  %vm3374_vm2 = vmmov 0  }
 0x6a8   : > { %v1906_v5 = vmax.f32 %v1862_v58, %v1891_v37  ;;  %v2299_v37 = vld [vmem:[%s4405_s8 + $0x80] sm:$0xff] }
 0x6a9   : > { %1930 = vrot.lane.b32.xlu0 %v1907_v31, %s3368_s18 }
 0x6aa   : > { %1928 = vrot.lane.b32.xlu1 %v1906_v5, %s3368_s18 }
 0x70f   : > { %v1919_v20 = vpop.permute.xlu0 %1918 }
 0x710   : > { %v1945_v18 = vmax.f32 %v1901_v23, %v1919_v20  ;;  %v1917_v19 = vpop.permute.xlu1 %1916  ;;  %v2002_v23 = vld [vmem:[#allocation7 + $0x190] sm:$0xff] }
 0x711   : > { %v1932_v33 = vsel %vm1582_vm1, %v1917_v19, %v1919_v20  ;;  %v3035_v20 = vpack.c.bf16 %v2284_v26, %v2283_v16  ;;  %v2302_v19 = vld [vmem:[%s4405_s8 + $0x98] sm:$0xff] }
 0x712   : > { %v4132_v44 = vmax.f32 %v1900_v63, %v1932_v33  ;;  %2592 = vmatprep.mubr.msk.f32.mxu1 %vm2030_vm8, %v1945_v18  ;;  %v2005_v63 = vld [vmem:[#allocation7 + $0x1a8] sm:$0xff] }
 0x713   : > { %v1923_v58 = vpop.permute.xlu0 %1922  ;;  %v3018_v15 = vpack.c.bf16 %v2005_v63, %v2002_v23 }
 0x714   : > { %v4135_v51 = vmax.f32 %v1903_v32, %v1923_v58  ;;  %2118 = vmatmul.mubr.f32.vlgmr.msra.gmra.mrb[18].mxu1 %v4132_v44  ;;  %v1921_v13 = vpop.permute.xlu1 %1920  ;;  %v3021_v32 = vpack.c.bf16 %v2011_v38, %v2008_v36  ;;  %v2227_v36 = vld [vmem:[%s4404_s7] sm:$0xff]  ;;  %v2230_v38 = vld [vmem:[%s4404_s7 + $0x18] sm:$0xff] }
 0x715   : > { %2995 = vmatpush1.bf16.msra.mxu1 %v2994_v43  ;;  %v1933_v45 = vsel %vm1582_vm1, %v1921_v13, %v1923_v58  ;;  %v2285_v43 = vld [vmem:[%s4405_s8 + $0x10] sm:$0xff]  ;;  %v2304_v58 = vld [vmem:[%s4405_s8 + $0xa8] sm:$0xff]  ;;  %v2287_v13 = vld [vmem:[%s4405_s8 + $0x20] sm:$0xff] }
 0x716   : > { %v4139_v59 = vmax.f32 %v1902_v40, %v1933_v45  ;;  %2593 = vmatprep.mubr.msk.f32.mxu1 %vm2030_vm8, %v4135_v51  ;;  %2996 = vmatprep.subr.bf16.mxu1 %v3373_v22  ;;  %v2014_v40 = vld [vmem:[#allocation7 + $0x1f0] sm:$0xff]  ;;  %v2288_v45 = vld [vmem:[%s4405_s8 + $0x28] sm:$0xff] }
 0x717   : > { %v1927_v50 = vpop.permute.xlu0 %1926  ;;  %v3024_v47 = vpack.c.bf16 %v2017_v25, %v2014_v40  ;;  %v2231_v40 = vld [vmem:[%s4404_s7 + $0x20] sm:$0xff] }
 0x718   : > { %v4144_v53 = vmax.f32 %v1905_v1, %v1927_v50  ;;  %2124 = vmatmul.mubr.f32.gmra.mrb[20].mxu1 %v4139_v59  ;;  %v1925_v46 = vpop.permute.xlu1 %1924  ;;  %v2023_v1 = vld [vmem:[#allocation7 + $0x238] sm:$0xff] }
 0x719   : > { %2998 = vmatpush1.bf16.msra.mxu1 %v2997_v35  ;;  %v1934_v8 = vsel %vm1582_vm1, %v1925_v46, %v1927_v50  ;;  %v3043_v35 = vpack.c.bf16 %v2288_v45, %v2287_v13  ;;  %v2289_v50 = vld [vmem:[%s4405_s8 + $0x30] sm:$0xff] }
 0x71a   : > { %v4148_v49 = vmax.f32 %v1904_v41, %v1934_v8  ;;  %2594 = vmatprep.mubr.msk.f32.mxu1 %vm2030_vm8, %v4144_v53  ;;  %2999 = vmatprep.subr.bf16.mxu1 %v3373_v22  ;;  %v3027_v41 = vpack.c.bf16 %v2023_v1, %v2020_v34  ;;  %v2307_v8 = vld [vmem:[%s4405_s8 + $0xc0] sm:$0xff] }
 0x71b   : > { %v1931_v55 = vpop.permute.xlu0 %1930 }
 0x71c   : > { %v4153_v57 = vmax.f32 %v1907_v31, %v1931_v55  ;;  %2130 = vmatmul.mubr.f32.gmra.mrb[22].mxu1 %v4148_v49  ;;  %v1929_v62 = vpop.permute.xlu1 %1928  ;;  %v2300_v31 = vld [vmem:[%s4405_s8 + $0x88] sm:$0xff] }
 0x71d   : > { %3001 = vmatpush1.bf16.msra.mxu1 %v3000_v27  ;;  %v1935_v17 = vsel %vm1582_vm1, %v1929_v62, %v1931_v55  ;;  %v3033_v42 = vpack.c.bf16 %v2300_v31, %v2299_v37  ;;  %v2308_v27 = vld [vmem:[%s4405_s8 + $0xc8] sm:$0xff]  ;;  %v3051_v55 = vpack.c.bf16 %v2292_v54, %v2291_v52  ;;  %v2310_v62 = vld [vmem:[%s4405_s8 + $0xd8] sm:$0xff] }
 0x71e   : > { %v1950_v60 = vmax.f32 %v1906_v5, %v1935_v17  ;;  %2595 = vmatprep.mubr.msk.f32.mxu1 %vm2030_vm8, %v4153_v57  ;;  %3002 = vmatprep.subr.bf16.mxu1 %v3373_v22  ;;  %v3030_v5 = vpack.c.bf16 %v2029_v39, %v2026_v10  ;;  %v2233_v39 = vld [vmem:[%s4404_s7 + $0x30] sm:$0xff]  ;;  %v2234_v31 = vld [vmem:[%s4404_s7 + $0x38] sm:$0xff] }
 0x720   : > { %2136 = vmatmul.mubr.f32.gmra.mrb[24].mxu1 %v1950_v60 }
 0x721   : > { %3004 = vmatpush1.bf16.msra.mxu1 %v3003_v61  ;;  %2597 = vmatprep.mubr.msk.f32.mxu1 %vm2030_vm8, %v1945_v18  ;;  %v2301_v18 = vld [vmem:[%s4405_s8 + $0x90] sm:$0xff] }
 0x722   : > { %3005 = vmatprep.subr.bf16.mxu1 %v3373_v22  ;;  %v3037_v33 = vpack.c.bf16 %v2302_v19, %v2301_v18  ;;  %v2293_v61 = vld [vmem:[%s4405_s8 + $0x50] sm:$0xff]  ;;  %v2236_v18 = vld [vmem:[%s4404_s7 + $0x48] sm:$0xff] }
 0x725   : > { %3007 = vmatpush1.bf16.msra.mxu1 %v3006_v0  ;;  %v2312_v0 = vld [vmem:[%s4405_s8 + $0xe8] sm:$0xff] }
 0x726   : > { %3008 = vmatprep.subr.bf16.mxu1 %v3373_v22  ;;  %v3057_v9 = vpack.c.bf16 %v2312_v0, %v2311_v48  ;;  %v2321_v0 = vld [vmem:[%s4405_s8 + $0x130] sm:$0xff] }
 0x729   : > { %3010 = vmatpush1.bf16.msra.mxu1 %v3009_v11  ;;  %v2296_v11 = vld [vmem:[%s4405_s8 + $0x68] sm:$0xff] }
 0x72a   : > { %3011 = vmatprep.subr.bf16.mxu1 %v3373_v22  ;;  %v3059_v7 = vpack.c.bf16 %v2296_v11, %v2295_v28  ;;  %v2229_v11 = vld [vmem:[%s4404_s7 + $0x10] sm:$0xff] }
 0x72d   : > { %3013 = vmatpush1.bf16.msra.mxu1 %v3012_v14  ;;  %v2314_v14 = vld [vmem:[%s4405_s8 + $0xf8] sm:$0xff] }
 0x72e   : > { %3014 = vmatprep.subr.bf16.mxu1 %v3373_v22  ;;  %v3061_v29 = vpack.c.bf16 %v2314_v14, %v2313_v12  ;;  %v2232_v12 = vld [vmem:[%s4404_s7 + $0x28] sm:$0xff] }
 0x731   : > { %3016 = vmatpush1.bf16.msra.mxu1 %v3015_v2  ;;  %v2298_v2 = vld [vmem:[%s4405_s8 + $0x78] sm:$0xff] }
 0x732   : > { %3017 = vmatprep.subr.bf16.mxu1 %v3373_v22  ;;  %v3063_v23 = vpack.c.bf16 %v2298_v2, %v2297_v21 }
 0x735   : > { %3019 = vmatpush1.bf16.msra.mxu1 %v3018_v15 }
 0x736   : > { %3020 = vmatprep.subr.bf16.mxu1 %v3373_v22 }
 0x739   : > { %3022 = vmatpush1.bf16.msra.mxu1 %v3021_v32  ;;  %v2228_v32 = vld [vmem:[%s4404_s7 + $0x8] sm:$0xff] }
 0x73a   : > { %3023 = vmatprep.subr.bf16.mxu1 %v3373_v22 }
 0x73d   : > { %3025 = vmatpush1.bf16.msra.mxu1 %v3024_v47 }
 0x73e   : > { %3026 = vmatprep.subr.bf16.mxu1 %v3373_v22 }
 0x741   : > { %3028 = vmatpush1.bf16.msra.mxu1 %v3027_v41 }
 0x742   : > { %3029 = vmatprep.subr.bf16.mxu1 %v3373_v22 }
 0x745   : > { %3032 = vmatpush1.bf16.msk.msra.mxu1 %vm4094_vm6, %v3030_v5 }
 0x746   : > { %3034 = vmatprep.subr.bf16.mxu1 %v3033_v42 }
 0x748   : > { %2207 = vmatmul.mubr.f32.vlgmr.msra.gmra.mrb[26].mxu1 %v4132_v44  ;;  %v2286_v44 = vld [vmem:[%s4405_s8 + $0x18] sm:$0xff] }
 0x749   : > { %2598 = vmatprep.mubr.msk.f32.mxu1 %vm2030_vm8, %v4135_v51  ;;  %3036 = vmatpush3.bf16.msra.mxu1 %v3035_v20  ;;  %v3039_v56 = vpack.c.bf16 %v2286_v44, %v2285_v43  ;;  %v3041_v51 = vpack.c.bf16 %v2304_v58, %v2303_v24 }
 0x74a   : > { %3038 = vmatprep.subr.bf16.mxu1 %v3037_v33  ;;  %v2237_v33 = vld [vmem:[%s4404_s7 + $0x50] sm:$0xff] }
 0x74c   : > { %2212 = vmatmul.mubr.f32.gmra.mrb[28].mxu1 %v4139_v59  ;;  %v2305_v59 = vld [vmem:[%s4405_s8 + $0xb0] sm:$0xff] }
 0x74d   : > { %2599 = vmatprep.mubr.msk.f32.mxu1 %vm2030_vm8, %v4144_v53  ;;  %3040 = vmatpush3.bf16.msra.mxu1 %v3039_v56  ;;  %v3045_v6 = vpack.c.bf16 %v2306_v30, %v2305_v59  ;;  %v2290_v53 = vld [vmem:[%s4405_s8 + $0x38] sm:$0xff] }
 0x74e   : > { %3042 = vmatprep.subr.bf16.mxu1 %v3041_v51  ;;  %v3047_v46 = vpack.c.bf16 %v2290_v53, %v2289_v50 }
 0x750   : > { %2217 = vmatmul.mubr.f32.gmra.mrb[30].mxu1 %v4148_v49  ;;  %v3049_v49 = vpack.c.bf16 %v2308_v27, %v2307_v8  ;;  %v2315_v27 = vld [vmem:[%s4405_s8 + $0x100] sm:$0xff] }
 0x751   : > { %2600 = vmatprep.mubr.msk.f32.mxu1 %vm2030_vm8, %v4153_v57  ;;  %3044 = vmatpush3.bf16.msra.mxu1 %v3043_v35  ;;  %v2309_v57 = vld [vmem:[%s4405_s8 + $0xd0] sm:$0xff] }
 0x752   : > { %3046 = vmatprep.subr.bf16.mxu1 %v3045_v6  ;;  %v3053_v17 = vpack.c.bf16 %v2310_v62, %v2309_v57  ;;  %v2317_v62 = vld [vmem:[%s4405_s8 + $0x110] sm:$0xff] }
 0x754   : > { %2222 = vmatmul.mubr.f32.gmra.mrb[32].mxu1 %v1950_v60  ;;  %v2294_v60 = vld [vmem:[%s4405_s8 + $0x58] sm:$0xff] }
 0x755   : > { %3048 = vmatpush3.bf16.msra.mxu1 %v3047_v46  ;;  %v3055_v4 = vpack.c.bf16 %v2294_v60, %v2293_v61  ;;  %v2319_v60 = vld [vmem:[%s4405_s8 + $0x120] sm:$0xff] }
 0x756   : > { %3050 = vmatprep.subr.bf16.mxu1 %v3049_v49  ;;  %v2316_v49 = vld [vmem:[%s4405_s8 + $0x108] sm:$0xff] }
 0x759   : > { %3052 = vmatpush3.bf16.msra.mxu1 %v3051_v55  ;;  %v3066_v55 = vpack.c.bf16 %v2316_v49, %v2315_v27 }
 0x75a   : > { %3054 = vmatprep.subr.bf16.mxu1 %v3053_v17  ;;  %v2318_v17 = vld [vmem:[%s4405_s8 + $0x118] sm:$0xff] }
 0x75b   : > { %v3069_v61 = vpack.c.bf16 %v2318_v17, %v2317_v62 }
 0x75d   : > { %3056 = vmatpush3.bf16.msra.mxu1 %v3055_v4  ;;  %v2320_v4 = vld [vmem:[%s4405_s8 + $0x128] sm:$0xff] }
 0x75e   : > { %3058 = vmatprep.subr.bf16.mxu1 %v3057_v9  ;;  %v3072_v48 = vpack.c.bf16 %v2320_v4, %v2319_v60 }
 0x761   : > { %3060 = vmatpush3.bf16.msra.mxu1 %v3059_v7 }
 0x762   : > { %3062 = vmatprep.subr.bf16.mxu1 %v3061_v29 }
 0x765   : > { %3064 = vmatpush3.bf16.msra.mxu1 %v3063_v23 }
 0x766   : > { %3065 = vmatprep.subr.bf16.mxu1 %v3373_v22 }
 0x7e7   : > { %v2119_v63 = vpop.f32.mrb[18].mxu1 }
 0x7e8   : > { %v2121_v15 = vpop.f32.mrb[19].mxu1  ;;  %v2239_v47 = vmul.f32 %v2227_v36, %v2119_v63 }
 0x7e9   : > { %v2240_v41 = vmul.f32 %v2228_v32, %v2121_v15 }
 0x7eb   : > { %v2125_v25 = vpop.f32.mrb[20].mxu1 }
 0x7ec   : > { %v2242_v34 = vmul.f32 %v2230_v38, %v2125_v25  ;;  %v2127_v1 = vpop.f32.mrb[21].mxu1 }
 0x7ed   : > { %v2243_v10 = vmul.f32 %v2231_v40, %v2127_v1  ;;  %v2238_v40 = vld [vmem:[%s4404_s7 + $0x58] sm:$0xff] }
 0x7ee   : > { %v2251_v37 = vadd.f32 %v2242_v34, %v2239_v47 }
 0x7ef   : > { %v2260_v5 = vadd.f32 %v2243_v10, %v2240_v41  ;;  %v2131_v42 = vpop.f32.mrb[22].mxu1 }
 0x7f0   : > { %v2245_v16 = vmul.f32 %v2233_v39, %v2131_v42  ;;  %v2133_v26 = vpop.f32.mrb[23].mxu1 }
 0x7f1   : > { %v2246_v20 = vmul.f32 %v2234_v31, %v2133_v26 }
 0x7f2   : > { %v2252_v19 = vadd.f32 %v2251_v37, %v2245_v16 }
 0x7f3   : > { %v2261_v43 = vadd.f32 %v2260_v5, %v2246_v20  ;;  %v2137_v44 = vpop.f32.mrb[24].mxu1 }
 0x7f4   : > { %v2248_v56 = vmul.f32 %v2236_v18, %v2137_v44  ;;  %v2139_v24 = vpop.f32.mrb[25].mxu1 }
 0x7f5   : > { %v2249_v58 = vmul.f32 %v2237_v33, %v2139_v24  ;;  %v2323_v33 = vld [vmem:[%s4406_s9] sm:$0x1] }
 0x7f6   : > { %v2253_v51 = vadd.f32 %v2252_v19, %v2248_v56 }
 0x7f7   : > { %v2262_v13 = vadd.f32 %v2261_v43, %v2249_v58 }
 0x7f8   : > { %v2254_v45 = vrot.slane %v2253_v51, 4 }
 0x7f9   : > { %v2263_v35 = vrot.slane %v2262_v13, 4 }
 0x7fa   : > { %v2255_v59 = vadd.f32 %v2254_v45, %v2253_v51 }
 0x7fb   : > { %v2264_v30 = vadd.f32 %v2263_v35, %v2262_v13 }
 0x7fc   : > { %v2256_v6 = vrot.slane %v2255_v59, 2 }
 0x7fd   : > { %v2265_v50 = vrot.slane %v2264_v30, 2 }
 0x7fe   : > { %v2257_v53 = vadd.f32 %v2256_v6, %v2255_v59 }
 0x7ff   : > { %v2266_v46 = vadd.f32 %v2265_v50, %v2264_v30 }
 0x800   : > { %v2258_v8 = vrot.slane %v2257_v53, 1 }
 0x801   : > { %v2267_v52 = vrot.slane %v2266_v46, 1 }
 0x802   : > { %v2259_v57 = vadd.f32 %v2258_v8, %v2257_v53 }
 0x803   : > { %v2268_v54 = vadd.f32 %v2267_v52, %v2266_v46 }
 0x805   : > { %2391 = vmatprep.mubr.f32.mxu1 %v2268_v54 }
 0x806   : > { %2392 = vmatmul.mubr.f32.vlgmr.msra.gmra.mrb[34].mxu1 %v2259_v57 }
 0x807   : > { %3067 = vmatpush3.bf16.msra.mxu1 %v3066_v55  ;;  %2676 = vmatprep.mubr.msk.f32.mxu1 %vm3374_vm2, %v3365_v3  ;;  %v2322_v3 = vld [vmem:[%s4405_s8 + $0x138] sm:$0xff] }
 0x808   : > { %3068 = vmatprep.subr.bf16.mxu1 %v3373_v22  ;;  %v3075_v9 = vpack.c.bf16 %v2322_v3, %v2321_v0 }
 0x80b   : > { %3070 = vmatpush3.bf16.msra.mxu1 %v3069_v61 }
 0x80c   : > { %3071 = vmatprep.subr.bf16.mxu1 %v3373_v22 }
 0x80f   : > { %3073 = vmatpush3.bf16.msra.mxu1 %v3072_v48 }
 0x810   : > { %3074 = vmatprep.subr.bf16.mxu1 %v3373_v22  ;;  %v2235_v22 = vld [vmem:[%s4404_s7 + $0x40] sm:$0xff] }
 0x813   : > { %3076 = vmatpush3.bf16.msra.mxu1 %v3075_v9 }
 0x81b   : > { %v2208_v28 = vpop.f32.mrb[26].mxu1 }
 0x81c   : > { %v2210_v7 = vpop.f32.mrb[27].mxu1  ;;  %v2241_v14 = vmul.f32 %v2229_v11, %v2208_v28 }
 0x81e   : > { %v2270_v23 = vsel %vm2269_vm9, %v2241_v14, 0.0 }
 0x81f   : > { %v2213_v21 = vpop.f32.mrb[28].mxu1 }
 0x820   : > { %v2244_v29 = vmul.f32 %v2232_v12, %v2213_v21  ;;  %v2215_v2 = vpop.f32.mrb[29].mxu1 }
 0x822   : > { %v2271_v63 = vsel %vm2269_vm9, %v2244_v29, 0.0 }
 0x823   : > { %v2272_v15 = vadd.f32 %v2271_v63, %v2270_v23  ;;  %v2218_v36 = vpop.f32.mrb[30].mxu1 }
 0x824   : > { %v2247_v38 = vmul.f32 %v2235_v22, %v2218_v36  ;;  %v2220_v32 = vpop.f32.mrb[31].mxu1 }
 0x826   : > { %v2273_v25 = vsel %vm2269_vm9, %v2247_v38, 0.0 }
 0x827   : > { %v2274_v47 = vadd.f32 %v2273_v25, %v2272_v15  ;;  %v2223_v34 = vpop.f32.mrb[32].mxu1 }
 0x828   : > { %v2250_v1 = vmul.f32 %v2238_v40, %v2223_v34  ;;  %v2225_v41 = vpop.f32.mrb[33].mxu1 }
 0x82a   : > { %v2275_v10 = vsel %vm2269_vm9, %v2250_v1, 0.0 }
 0x82b   : > { %v2276_v39 = vadd.f32 %v2275_v10, %v2274_v47 }
 0x82d   : > { %v2277_v37 = vrot.slane %v2276_v39, 4 }
 0x82f   : > { %v2278_v31 = vadd.f32 %v2277_v37, %v2276_v39 }
 0x831   : > { %v2279_v5 = vrot.slane %v2278_v31, 2 }
 0x833   : > { %v2280_v42 = vadd.f32 %v2279_v5, %v2278_v31 }
 0x835   : > { %v2281_v16 = vrot.slane %v2280_v42, 1 }
 0x837   : > { %v2282_v26 = vadd.f32 %v2281_v16, %v2280_v42 }
 0x839   : > { %2677 = vmatmul.mubr.msk.f32.vlgmr.msra.gmra.mrb[36].mxu1 %vm2269_vm9, %v2282_v26 }
 0x8d9   : > { %v2641_v20 = vpop.f32.mrb[34].mxu1 }
 0x8da   : > { %v2642_v18 = vpop.f32.mrb[35].mxu1 }
 0x8db   : > { %v2643_v19 = vadd.f32 %v2642_v18, %v2641_v20 }
 0x8dd   : > { %v2394_v43 = vadd.f32 %v2643_v19, %v2323_v33 }
 0x90c   : > { %v2463_v44 = vpop.f32.mrb[36].mxu1 }
 0x90d   : > { %v2464_v56 = vadd.f32 %v2463_v44, %v2394_v43  ;;  %v2678_v24 = vpop.f32.mrb[37].mxu1 }
 0x90f   : > { %2467 = vst [vmem:[%s379_s24] sm:$0x1] %v2464_v56 }
 0x910   : > { %3292 = shalt.err (!%p3289_p11)
}
 0x911   : > { %s3293_s21 = scalar_lea.hbm %s4355_s30, 16  ;;  %s3297_s20 = scalar_lea.hbm %s4407_s10, 32 }
 0x912   : > { %p3294_p13 = scmp.ne.s32.totalorder %s4355_s30, %s3293_s21  ;;  %p3298_p6 = scmp.lt.u32.totalorder %s4355_s30, %s4407_s10 }
 0x913   : > { %p3299_p9 = scmp.lt.u32.totalorder %s3297_s20, %s3293_s21  ;;  %p3301_p12 = scmp.lt.u32.totalorder %s3293_s21, %s4355_s30 }
 0x914   : > { %p3295_p0 = pnand %p3294_p13, %p4434_p1 }
 0x915   : > { %p3300_p10 = por %p3299_p9, %p3298_p6 }
 0x916   : > { %p3296_p5 = pneg %p3295_p0 }
 0x917   : > { %p3302_p2 = por %p3301_p12, %p3300_p10 }
 0x919   : > { %p3303_p3 = pnand %p3302_p2, %p3296_p5 }
 0x91b   : > { %3306 = shalt.err (!%p3303_p3)
}
 0x91c   : > { %3097 = dma.vmem_to_hbm [thread:$0]  (%p4434_p1), %s4357_s11, 16, %s4355_s30, %s2469_s25  }
 0x91d PF: > { %s4435_s24 = sld [smem:[#allocation16_spill]]  ;;  %p3114_p4 = scmp.ge.s32.totalorder %s3349_s16, 2 }
 0x91e   : > { %s2493_s28 = sand.u32 1, %s3337_s13  }
 0x91f   : > { %s2494_s26 = scalar_lea.sflag [#allocation6], %s2493_s28 }
 0x923   : > { %p4436_p7 = scmp.ne.s32.totalorder %s4435_s24, 0 }
 0x925   : > { %p3107_p8 = pnand %p3114_p4, %p4436_p7 }
 0x927   : > { %3332 = dma.done.wait (!%p3107_p8), %s2494_s26, 16  }
 0x928   : > { %3334 = vsyncadd (!%p3107_p8), %s2494_s26, 4294967280  ;;  %s4437_s16 = sld [smem:[#allocation14_spill]]  ;;  %s4438_s12 = sld [smem:[#allocation13_spill]] }
 0x929   : > { %s4439_s15 = sld [smem:[#allocation15_spill]]  ;;  %s4440_s13 = smov %s3341_s14 }
 0x92e   : > { %p22_p11 = scmp.ge.s32.totalorder %s4437_s16, 4   ;;  %s4441_s14 = smov %s4438_s12 }
 0x930   :  { %24 = sbr.rel (!%p22_p11) target bundleno = 5 (0x5), region = 112 }
 0x937   :  { %2498 = vsyncpa [#allocation5], 1 }
 0x938   :  { %2500 = vsyncpa [#allocation5 + $0x1], 1 }
 0x939   :  { %2501 = vsyncpa [#allocation8], 1 }
 0x93a   :  { %2502 = vsyncpa [#allocation6], 1 }
 0x93b   :  { %2504 = vsyncpa [#allocation6 + $0x1], 1 }

</bundles_post_ra>
